<compile_context>
chip_gen: v5e
topology: v5e:2x2
jax: 0.10.0
libtpu: 0.0.40
codegen_flags: <defaults>
</compile_context>

<pallas_src>
import jax
import jax.numpy as jnp
from jax.experimental import pallas as pl
from jax.experimental.pallas import tpu as pltpu

H = 256   # hidden_dim (matches the PyTorch module)
V = 16    # input_dim (vocab size, small demo)


# --------------------------------------------------------------------------
# Kernel: one GRU step per grid iteration, hidden state carried in VMEM.
# --------------------------------------------------------------------------
def encoder_gru_seq_kernel(tok_ref,     # SMEM (T,) int32 scalar-prefetch (drives emb gather)
                           emb_ref,     # (1, 1, H)  bf16 — gathered embedding row for step t
                           h0_ref,      # (1, H)     f32  — initial hidden (resident)
                           w_ref,       # (2H, 4H)   bf16 — fused gate weights (resident)
                           b_ref,       # (1, 4H)    f32  — fused gate bias   (resident)
                           out_ref,     # (1, 1, H)  f32  — per-step output (== new hidden)
                           h_scratch):  # VMEM (1, H) f32 — carried hidden state
    del tok_ref  # only used by the embedding index_map
    t = pl.program_id(0)

    @pl.when(t == 0)
    def _():
        h_scratch[...] = h0_ref[...]

    x = emb_ref[0]                                        # (1, H) bf16
    h = h_scratch[...]                                    # (1, H) f32

    # One fused MXU dot: [x | h] (1, 2H) @ W_big (2H, 4H) -> [rz_sum | i_n | h_n]
    xh = jnp.concatenate([x, h.astype(jnp.bfloat16)], axis=1)          # (1, 2H) bf16
    g = jnp.dot(xh, w_ref[...], preferred_element_type=jnp.float32)    # (1, 4H) f32
    g = g + b_ref[...]

    r = jax.nn.sigmoid(g[:, 0:H])                         # i_r + h_r (+ b_ir + b_hr)
    z = jax.nn.sigmoid(g[:, H:2 * H])                     # i_z + h_z (+ b_iz + b_hz)
    n = jnp.tanh(g[:, 2 * H:3 * H] + r * g[:, 3 * H:4 * H])  # i_n + r*(h_n + b_hn)
    h_new = (1.0 - z) * n + z * h                         # f32 carry

    h_scratch[...] = h_new
    out_ref[0] = h_new.astype(out_ref.dtype)


# --------------------------------------------------------------------------
# One-time parameter preparation (hoisted out of the per-call hot path).
# --------------------------------------------------------------------------
def prepare_params(params, weight_dtype=jnp.bfloat16):
    """Fuse W_ih/W_hh into one (2H, 4H) matrix, fold r/z biases, cast to bf16."""
    emb, w_ih, w_hh, b_ih, b_hh = params
    wih_t = jnp.transpose(w_ih)          # (H, 3H), gate order r|z|n
    whh_t = jnp.transpose(w_hh)          # (H, 3H)
    zeros = jnp.zeros((H, H), jnp.float32)
    # columns of W_big: [r(sum) | z(sum) | i_n | h_n]; rows: [x-part ; h-part]
    top = jnp.concatenate([wih_t, zeros], axis=1)                              # (H, 4H)
    bot = jnp.concatenate([whh_t[:, :2 * H], zeros, whh_t[:, 2 * H:]], axis=1)  # (H, 4H)
    w_big = jnp.concatenate([top, bot], axis=0).astype(weight_dtype)           # (2H, 4H)
    b_big = jnp.concatenate([b_ih[0:H] + b_hh[0:H],
                             b_ih[H:2 * H] + b_hh[H:2 * H],
                             b_ih[2 * H:3 * H],
                             b_hh[2 * H:3 * H]]).reshape(1, 4 * H).astype(jnp.float32)
    emb3 = emb.astype(weight_dtype).reshape(V, 1, H)       # (V, 1, H) for (1,1,H) row gather
    return emb3, w_big, b_big


# --------------------------------------------------------------------------
# Wrappers
# --------------------------------------------------------------------------
def encoder_rnn_sequence(tokens, hidden_0, prepped):
    """Run the encoder over a whole token sequence in one pallas_call.

    tokens: (T,) int32; hidden_0: (1,1,H).
    Returns (outputs (T,1,1,H), final hidden (1,1,H))."""
    emb3, w_big, b_big = prepped
    tok = jnp.clip(jnp.asarray(tokens, jnp.int32).reshape(-1), 0, V - 1)
    T = tok.shape[0]
    h0 = hidden_0.reshape(1, H).astype(jnp.float32)

    outs = pl.pallas_call(
        encoder_gru_seq_kernel,
        out_shape=jax.ShapeDtypeStruct((T, 1, H), jnp.float32),
        grid_spec=pltpu.PrefetchScalarGridSpec(
            num_scalar_prefetch=1,
            grid=(T,),
            in_specs=[
                # embedding row gather driven by the prefetched token ids
                pl.BlockSpec((1, 1, H), lambda t, ids: (ids[t], 0, 0)),
                pl.BlockSpec((1, H), lambda t, ids: (0, 0)),          # h0 (resident)
                pl.BlockSpec((2 * H, 4 * H), lambda t, ids: (0, 0)),  # fused W (resident)
                pl.BlockSpec((1, 4 * H), lambda t, ids: (0, 0)),      # fused bias (resident)
            ],
            out_specs=pl.BlockSpec((1, 1, H), lambda t, ids: (t, 0, 0)),
            scratch_shapes=[pltpu.VMEM((1, H), jnp.float32)],
        ),
        compiler_params=pltpu.CompilerParams(
            dimension_semantics=("arbitrary",)),   # sequential carry over time
    )(tok, emb3, h0, w_big, b_big)

    outputs = outs.reshape(T, 1, 1, H)             # per-step GRU outputs
    hidden = outs[T - 1].reshape(1, 1, H)          # final hidden == last output
    return outputs, hidden


def encoder_rnn_forward(token_id, hidden_0, prepped):
    """Original EncoderRNN.forward signature: one token -> (output, hidden), each (1,1,H)."""
    tokens = jnp.reshape(jnp.asarray(token_id, jnp.int32), (1,))
    outputs, hidden = encoder_rnn_sequence(tokens, hidden_0, prepped)
    return outputs[0], hidden


# --------------------------------------------------------------------------
# Params + pure-JAX reference (mirrors the kernel's bf16-weight rounding).
# --------------------------------------------------------------------------
def init_params(key):
    k_emb, k_wih, k_whh, k_bih, k_bhh = jax.random.split(key, 5)
    bound = 1.0 / jnp.sqrt(H)
    emb = jax.random.normal(k_emb, (V, H), jnp.float32)                       # nn.Embedding
    w_ih = jax.random.uniform(k_wih, (3 * H, H), jnp.float32, -bound, bound)  # nn.GRU weight_ih_l0
    w_hh = jax.random.uniform(k_whh, (3 * H, H), jnp.float32, -bound, bound)  # nn.GRU weight_hh_l0
    b_ih = jax.random.uniform(k_bih, (3 * H,), jnp.float32, -bound, bound)
    b_hh = jax.random.uniform(k_bhh, (3 * H,), jnp.float32, -bound, bound)
    return emb, w_ih, w_hh, b_ih, b_hh


def reference_sequence(tokens, hidden_0, params, weight_dtype=jnp.bfloat16):
    """PyTorch GRU-cell semantics, with the same bf16 rounding policy as the kernel."""
    emb, w_ih, w_hh, b_ih, b_hh = params
    embq = emb.astype(weight_dtype).astype(jnp.float32)
    wih = w_ih.astype(weight_dtype).astype(jnp.float32)
    whh = w_hh.astype(weight_dtype).astype(jnp.float32)
    h = hidden_0.reshape(1, H).astype(jnp.float32)
    outs = []
    for t in range(int(tokens.shape[0])):
        x = embq[int(tokens[t])].reshape(1, H)
        hq = h.astype(weight_dtype).astype(jnp.float32)    # matmul input rounding
        gi = x @ wih.T + b_ih
        gh = hq @ whh.T + b_hh
        i_r, i_z, i_n = gi[:, :H], gi[:, H:2 * H], gi[:, 2 * H:]
        h_r, h_z, h_n = gh[:, :H], gh[:, H:2 * H], gh[:, 2 * H:]
        r = jax.nn.sigmoid(i_r + h_r)
        z = jax.nn.sigmoid(i_z + h_z)
        n = jnp.tanh(i_n + r * h_n)
        h = (1.0 - z) * n + z * h
        outs.append(h)
    outputs = jnp.stack(outs).reshape(-1, 1, 1, H)
    return outputs, h.reshape(1, 1, H)


if __name__ == "__main__":
    key = jax.random.PRNGKey(0)
    params = init_params(key)
    prepped = prepare_params(params)           # one-time weight fusion / cast

    T = 8
    tokens = jax.random.randint(jax.random.PRNGKey(1), (T,), 0, V, dtype=jnp.int32)
    hidden_0 = jnp.zeros((1, 1, H), jnp.float32)     # EncoderRNN.initHidden()

    # Full-sequence path: whole sequence in one pallas_call.
    outputs, hidden = encoder_rnn_sequence(tokens, hidden_0, prepped)
    outputs = jax.block_until_ready(outputs)
    hidden = jax.block_until_ready(hidden)

    ref_outputs, ref_hidden = reference_sequence(tokens, hidden_0, params)
    assert outputs.shape == (T, 1, 1, H) and hidden.shape == (1, 1, H)
    assert jnp.allclose(outputs, ref_outputs, atol=2e-3, rtol=2e-3)
    assert jnp.allclose(hidden, ref_hidden, atol=2e-3, rtol=2e-3)

    # Single-step path (original forward(input, hidden_0) signature) = T == 1 case.
    out1, hid1 = encoder_rnn_forward(tokens[0], hidden_0, prepped)
    out1 = jax.block_until_ready(out1)
    hid1 = jax.block_until_ready(hid1)
    ref_o1, ref_h1 = reference_sequence(tokens[:1], hidden_0, params)
    assert out1.shape == (1, 1, H) and hid1.shape == (1, 1, H)
    assert jnp.allclose(out1, ref_o1[0], atol=2e-3, rtol=2e-3)
    assert jnp.allclose(hid1, ref_h1, atol=2e-3, rtol=2e-3)

    print("KERNEL_OK")
</pallas_src>

<mosaic_0001>
module attributes {stable_mosaic.version = 11 : i64} {
  func.func @encoder_gru_seq_kernel(%arg0: i32, %arg1: memref<8xi32, #tpu.memory_space<smem>>, %arg2: memref<1x1x256xbf16, #tpu.memory_space<vmem>>, %arg3: memref<1x256xf32, #tpu.memory_space<vmem>>, %arg4: memref<512x1024xbf16, #tpu.memory_space<vmem>>, %arg5: memref<1x1024xf32, #tpu.memory_space<vmem>>, %arg6: memref<1x1x256xf32, #tpu.memory_space<vmem>>, %arg7: memref<1x256xf32, #tpu.memory_space<vmem>>) attributes {dimension_semantics = [#tpu.dimension_semantics<arbitrary>], iteration_bounds = array<i64: 8>, scalar_prefetch = 1 : i64, scratch_operands = 1 : i64, tpu.core_type = #tpu.core_type<tc>, window_params = [{transform_indices = @transform_0, window_bounds = array<i64: 1, 1, 256>}, {pipeline_mode = #tpu.pipeline_mode<synchronous>, transform_indices = @transform_1, window_bounds = array<i64: 1, 256>}, {pipeline_mode = #tpu.pipeline_mode<synchronous>, transform_indices = @transform_2, window_bounds = array<i64: 512, 1024>}, {pipeline_mode = #tpu.pipeline_mode<synchronous>, transform_indices = @transform_3, window_bounds = array<i64: 1, 1024>}, {transform_indices = @transform_4, window_bounds = array<i64: 1, 1, 256>}]} {
    %c0_i32 = arith.constant 0 : i32
    %0 = arith.cmpi eq, %arg0, %c0_i32 : i32
    %1 = arith.extui %0 : i1 to i32
    %c0_i32_0 = arith.constant 0 : i32
    %2 = arith.cmpi ne, %1, %c0_i32_0 : i32
    scf.if %2 {
      %c0_17 = arith.constant 0 : index
      %c0_18 = arith.constant 0 : index
      %38 = vector.load %arg3[%c0_17, %c0_18] : memref<1x256xf32, #tpu.memory_space<vmem>>, vector<1x256xf32>
      %c0_19 = arith.constant 0 : index
      %c0_20 = arith.constant 0 : index
      %39 = vector.load %arg7[%c0_19, %c0_20] : memref<1x256xf32, #tpu.memory_space<vmem>>, vector<1x256xf32>
      tpu.vector_store %arg7[%c0_19, %c0_20], %38 {strides = array<i32>} : memref<1x256xf32, #tpu.memory_space<vmem>>, vector<1x256xf32>,
    } else {
    }
    %c0 = arith.constant 0 : index
    %c0_1 = arith.constant 0 : index
    %c0_2 = arith.constant 0 : index
    %3 = vector.load %arg2[%c0, %c0_1, %c0_2] : memref<1x1x256xbf16, #tpu.memory_space<vmem>>, vector<1x1x256xbf16>
    %4 = vector.shape_cast %3 : vector<1x1x256xbf16> to vector<1x256xbf16>
    %c0_3 = arith.constant 0 : index
    %c0_4 = arith.constant 0 : index
    %5 = vector.load %arg7[%c0_3, %c0_4] : memref<1x256xf32, #tpu.memory_space<vmem>>, vector<1x256xf32>
    %6 = arith.truncf %5 : vector<1x256xf32> to vector<1x256xbf16>
    %7 = tpu.concatenate %4, %6 in 1 : vector<1x256xbf16>, vector<1x256xbf16> -> vector<1x512xbf16>
    %c0_5 = arith.constant 0 : index
    %c0_6 = arith.constant 0 : index
    %8 = vector.load %arg4[%c0_5, %c0_6] : memref<512x1024xbf16, #tpu.memory_space<vmem>>, vector<512x1024xbf16>
    %cst = arith.constant dense<0.000000e+00> : vector<1x1024xf32>
    %9 = tpu.matmul %7, %8, %cst {dimension_numbers = #tpu.dot_dimension_numbers<[1], [0], [0], [1], [0, 0, 1, 1], [], []>} : vector<1x512xbf16>, vector<512x1024xbf16>, vector<1x1024xf32> -> vector<1x1024xf32>
    %c0_7 = arith.constant 0 : index
    %c0_8 = arith.constant 0 : index
    %10 = vector.load %arg5[%c0_7, %c0_8] : memref<1x1024xf32, #tpu.memory_space<vmem>>, vector<1x1024xf32>
    %11 = arith.addf %9, %10 : vector<1x1024xf32>
    %12 = vector.extract_strided_slice %11 {offsets = [0, 0], sizes = [1, 256], strides = [1, 1]} : vector<1x1024xf32> to vector<1x256xf32>
    %13 = arith.negf %12 : vector<1x256xf32>
    %14 = math.exp %13 : vector<1x256xf32>
    %cst_9 = arith.constant 1.000000e+00 : f32
    %15 = vector.broadcast %cst_9 : f32 to vector<1x256xf32>
    %16 = arith.addf %15, %14 : vector<1x256xf32>
    %17 = arith.divf %15, %16 : vector<1x256xf32>
    %18 = vector.extract_strided_slice %11 {offsets = [0, 256], sizes = [1, 256], strides = [1, 1]} : vector<1x1024xf32> to vector<1x256xf32>
    %19 = arith.negf %18 : vector<1x256xf32>
    %20 = math.exp %19 : vector<1x256xf32>
    %cst_10 = arith.constant 1.000000e+00 : f32
    %21 = vector.broadcast %cst_10 : f32 to vector<1x256xf32>
    %22 = arith.addf %21, %20 : vector<1x256xf32>
    %23 = arith.divf %21, %22 : vector<1x256xf32>
    %24 = vector.extract_strided_slice %11 {offsets = [0, 512], sizes = [1, 256], strides = [1, 1]} : vector<1x1024xf32> to vector<1x256xf32>
    %25 = vector.extract_strided_slice %11 {offsets = [0, 768], sizes = [1, 256], strides = [1, 1]} : vector<1x1024xf32> to vector<1x256xf32>
    %26 = arith.mulf %17, %25 : vector<1x256xf32>
    %27 = arith.addf %24, %26 : vector<1x256xf32>
    %28 = math.tanh %27 : vector<1x256xf32>
    %cst_11 = arith.constant 1.000000e+00 : f32
    %29 = vector.broadcast %cst_11 : f32 to vector<1x256xf32>
    %30 = arith.subf %29, %23 : vector<1x256xf32>
    %31 = arith.mulf %30, %28 : vector<1x256xf32>
    %32 = arith.mulf %23, %5 : vector<1x256xf32>
    %33 = arith.addf %31, %32 : vector<1x256xf32>
    %c0_12 = arith.constant 0 : index
    %c0_13 = arith.constant 0 : index
    %34 = vector.load %arg7[%c0_12, %c0_13] : memref<1x256xf32, #tpu.memory_space<vmem>>, vector<1x256xf32>
    tpu.vector_store %arg7[%c0_12, %c0_13], %33 {strides = array<i32>} : memref<1x256xf32, #tpu.memory_space<vmem>>, vector<1x256xf32>,
    %c0_14 = arith.constant 0 : index
    %c0_15 = arith.constant 0 : index
    %c0_16 = arith.constant 0 : index
    %35 = vector.load %arg6[%c0_14, %c0_15, %c0_16] : memref<1x1x256xf32, #tpu.memory_space<vmem>>, vector<1x1x256xf32>
    %36 = vector.shape_cast %35 : vector<1x1x256xf32> to vector<1x256xf32>
    %37 = vector.shape_cast %33 : vector<1x256xf32> to vector<1x1x256xf32>
    tpu.vector_store %arg6[%c0_14, %c0_15, %c0_16], %37 {strides = array<i32>} : memref<1x1x256xf32, #tpu.memory_space<vmem>>, vector<1x1x256xf32>,
    return
  }
  func.func @transform_0(%arg0: i32, %arg1: memref<8xi32, #tpu.memory_space<smem>>) -> (i32, i32, i32) {
    %0 = arith.index_cast %arg0 : i32 to index
    %1 = memref.load %arg1[%0] : memref<8xi32, #tpu.memory_space<smem>>
    %c0_i32 = arith.constant 0 : i32
    %c0_i32_0 = arith.constant 0 : i32
    %c0_i32_1 = arith.constant 0 : i32
    return %1, %c0_i32, %c0_i32_0 : i32, i32, i32
  }
  func.func @transform_1(%arg0: i32, %arg1: memref<8xi32, #tpu.memory_space<smem>>) -> (i32, i32) {
    %c0_i32 = arith.constant 0 : i32
    %c0_i32_0 = arith.constant 0 : i32
    %c0_i32_1 = arith.constant 0 : i32
    return %c0_i32, %c0_i32_0 : i32, i32
  }
  func.func @transform_2(%arg0: i32, %arg1: memref<8xi32, #tpu.memory_space<smem>>) -> (i32, i32) {
    %c0_i32 = arith.constant 0 : i32
    %c0_i32_0 = arith.constant 0 : i32
    %c0_i32_1 = arith.constant 0 : i32
    return %c0_i32, %c0_i32_0 : i32, i32
  }
  func.func @transform_3(%arg0: i32, %arg1: memref<8xi32, #tpu.memory_space<smem>>) -> (i32, i32) {
    %c0_i32 = arith.constant 0 : i32
    %c0_i32_0 = arith.constant 0 : i32
    %c0_i32_1 = arith.constant 0 : i32
    return %c0_i32, %c0_i32_0 : i32, i32
  }
  func.func @transform_4(%arg0: i32, %arg1: memref<8xi32, #tpu.memory_space<smem>>) -> (i32, i32, i32) {
    %c0_i32 = arith.constant 0 : i32
    %c0_i32_0 = arith.constant 0 : i32
    %c0_i32_1 = arith.constant 0 : i32
    return %arg0, %c0_i32, %c0_i32_0 : i32, i32, i32
  }
}

</mosaic_0001>

<bundles_post_ra>
// kernel: tpu_custom_call.1
= control target key start
LH: loop header
LB: loop body
LE: loop exit
PB: predicated region body
PF: predicated region fallthrough
CT: control target
= control target key end

     0   :  { %s3900_s21 = smov [#allocation4]   ;;  %s4156_s0 = inlined_call_operand.vmem [shape: s32[8], index: 0, kind: input, shape index: {}]   ;;  %s4157_s1 = inlined_call_operand.vmem [shape: bf16[16,1,256], index: 1, kind: input, shape index: {}]   ;;  %s4158_s2 = inlined_call_operand.vmem [shape: f32[1,256], index: 2, kind: input, shape index: {}]   ;;  %s4159_s3 = inlined_call_operand.hbm [shape: bf16[512,1024], index: 3, kind: input, shape index: {}]   ;;  %s4160_s4 = inlined_call_operand.vmem [shape: f32[1,1024], index: 4, kind: input, shape index: {}]   ;;  %s4161_s5 = inlined_call_operand.hbm [shape: f32[8,1,256], index: 5, kind: output, shape index: {}]  }
   0x1   :  { %s11_s20 = sshll.u32 %s4156_s0, 4  ;;  %s12_s20 = int_to_ptr.vmem [resolvable:$true] %s11_s20 }
   0x2   :  { %14 = dma.vmem_to_smem %s12_s20, 16, %s3900_s21, [#allocation3] }
   0x3   :  { %3874 = dma.done.wait [#allocation3], 16 }
   0x4   :  { %3875 = vsyncadd [#allocation3], 4294967280 }
   0x5   :  { %17 = sfence }
   0x6   :  { %18 = vsyncpa [#allocation6], 0 }
   0x7   :  { %19 = vsyncpa [#allocation7], 0 }
   0x8   :  { %21 = vsyncpa [#allocation7 + $0x1], 0  ;;  %s3937_s22 = smov 0   ;;  %s3939_s23 = smov 0  }
   0x9   :  { %s3941_s24 = smov 0   ;;  %s3943_s25 = smov 0  }
   0xa LB: > { %s3958_s0 = sadd.s32 4294967295, %s3898_s25   ;;  %s2416_s26 = sadd.s32 4294967294, %s3898_s25   ;;  %s3898_s25 = sphi %s3943_s25, %s4171_s25   ;;  %s3894_s24 = sphi %s3941_s24, %s4170_s24   ;;  %s3890_s23 = sphi %s3939_s23, %s4169_s23   ;;  %s3886_s22 = sphi %s3937_s22, %s4168_s22  }
   0xb   : > { %s3962_s27 = sadd.s32 1, %s3898_s25   ;;  %s125_s28 = sadd.s32 1, %s3894_s24 }
   0xc   : > { %s122_s29 = ssub.s32 %s3898_s25, %s3962_s27  ;;  %p135_p0 = scmp.ne.s32.totalorder %s3894_s24, %s3890_s23 }
   0xd   : > { %p123_p1 = scmp.eq.s32.totalorder %s122_s29, 0  ;;  %p136_p2 = scmp.eq.s32.totalorder %s3958_s0, 7 }
   0xe   : > { %p141_p3 = scmp.ne.s32.totalorder %s3890_s23, %s3886_s22  ;;  %p142_p4 = scmp.eq.s32.totalorder %s2416_s26, 7 }
   0xf   : > { %s3973_s30 = scalar_select %p123_p1, %s3894_s24, %s125_s28  }
  0x10   : > { %p3975_p5 = por %p136_p2, %p135_p0  ;;  %p3979_p6 = por %p142_p4, %p141_p3 }
  0x11   : > { %p2417_p7 = scmp.ge.s32.totalorder %s3898_s25, 1  ;;  %p149_p8 = scmp.lt.s32.totalorder %s3898_s25, 9 }
  0x12   : > { %p2418_p9 = scmp.ne.s32.totalorder %s3958_s0, 0  ;;  %p3727_p10 = scmp.eq.s32.totalorder %s3958_s0, 0 }
  0x13   : > { %p150_p11 = pnand %p2417_p7, %p149_p8  ;;  %s163_s10 = sshll.u32 %s4159_s3, 4  ;;  %s164_s10 = int_to_ptr.hbm [resolvable:$true] %s163_s10 }
  0x14   : > { %s3901_s11 = smov [#allocation5]   ;;  %s3902_s13 = smov 512  }
  0x15   : > { %p3719_p12 = pneg %p150_p11  ;;  %s165_s12 = sshll.u32 %s3901_s11, 4  ;;  %s166_s12 = int_to_ptr.vmem [resolvable:$true] %s165_s12 }
  0x16   : > { %s3903_s14 = smov 32   ;;  %193 = sbr.rel (%p150_p11) target bundleno = 495 (0x1ef), region = 36 }
  0x17   : > { %p3720_p13 = pnand %p3727_p10, %p3719_p12 }
  0x19   : > { %3722 = dma.hbm_to_vmem [thread:$0]  (!%p3720_p13), %s164_s10, 32768, %s166_s12, [#allocation6], %s3902_s13, %s3902_s13, %s3903_s14  }
  0x1b   : > { %3877 = dma.done.wait (%p3727_p10), [#allocation6], 32768  }
  0x1c   : > { %3879 = vsyncadd (%p3727_p10), [#allocation6], 4294934528  ;;  %s217_s15 = sand.u32 1, %s3890_s23   ;;  %s220_s16 = sld [smem:[#allocation4 + %s3958_s0]] }
  0x1d   : > { %s4000_s17 = sshll.u32 %s217_s15, 1 }
  0x1e   : > { %s219_s26 = scalar_lea.vmem [#allocation8], %s4000_s17 }
  0x22   : > { %p221_p0 = scmp.lt.s32.totalorder %s220_s16, 15  ;;  %229 = sbr.rel (%p2418_p9) target bundleno = 43 (0x2b), region = 44 }
  0x24   : > { %s4173_s16 = smov (!%p221_p0, %s220_s16), 15 }
  0x25   : > { %s2423_s18 = sshll.u32 %s4173_s16, 1 }
  0x26   : > { %s4005_s21 = scalar_lea.vmem %s4157_s1, %s2423_s18 }
  0x27   : > { %v230_v0 = vld [vmem:[%s4158_s2] sm:$0x3]  ;;  %v231_v1 = vlaneseq }
  0x29   : > { %vm233_vm0 = vcmp.lt.s32.totalorder %v231_v1, 256 }
  0x2a   : > { %235 = vst.msk [vmem:[#allocation2] sm:$0x3] %vm233_vm0, %v230_v0 }
  0x2b PF: > { %v2651_v2 = vld [vmem:[#allocation5 + $0x1c0] sm:$0xf]  ;;  %s3454_s10 = sshll.u32 %s3958_s0, 1  ;;  %s2342_s14 = sshll.u32 %s219_s26, 4  ;;  %s2343_s14 = int_to_ptr.vmem [resolvable:$true] %s2342_s14 }
  0x2c   : > { %v3517_v3 = vld [vmem:[#allocation5 + $0x1dc] sm:$0xf0]  ;;  %s2340_s13 = scalar_lea.hbm %s4161_s5, %s3454_s10  ;;  %s2330_s0 = scalar_lea.sflag [#allocation7], %s217_s15 }
  0x2d   : > { %v2907_v4 = vld [vmem:[#allocation5 + $0x3c0] sm:$0xf]  ;;  %v2652_v5 = vor.u32 %v3517_v3, %v2651_v2  ;;  %s2344_s16 = sshll.u32 %s2340_s13, 4  ;;  %s3850_s28 = scalar_lea.hbm %s4161_s5, 16  ;;  %s2345_s16 = int_to_ptr.hbm [resolvable:$true] %s2344_s16 }
  0x2e   : > { %v3581_v6 = vld [vmem:[#allocation5 + $0x3dc] sm:$0xf0]  ;;  %s3844_s18 = sshra.s32 %s2345_s16, 4  ;;  %s3845_s18 = int_to_ptr.hbm [resolvable:$true] %s3844_s18 }
  0x2f   : > { %v3163_v7 = vld [vmem:[#allocation5 + $0x5c0] sm:$0xf]  ;;  %v2908_v9 = vor.u32 %v3581_v6, %v2907_v4  ;;  %1811 = vmatpush.bf16.msra.mxu0 %v2652_v5  ;;  %s3846_s19 = scalar_lea.hbm %s3845_s18, 2  ;;  %p3851_p4 = scmp.lt.s32.totalorder %s3845_s18, %s4161_s5 }
  0x30   : > { %v3645_v8 = vld [vmem:[#allocation5 + $0x5dc] sm:$0xf0]  ;;  %p3847_p1 = scmp.ne.s32.totalorder %s3845_s18, %s3846_s19  ;;  %p3852_p7 = scmp.lt.s32.totalorder %s3850_s28, %s3846_s19 }
  0x31   : > { %v3164_v10 = vor.u32 %v3645_v8, %v3163_v7  ;;  %v3419_v11 = vld [vmem:[#allocation5 + $0x7c0] sm:$0xf]  ;;  %1824 = vmatpush.bf16.msra.mxu1 %v2908_v9 }
  0x32   : > { %v3709_v12 = vld [vmem:[#allocation5 + $0x7dc] sm:$0xf0]  ;;  %p3848_p2 = pnand %p3847_p1, %p3975_p5  ;;  %p3853_p8 = por %p3852_p7, %p3851_p4 }
  0x33   : > { %v2619_v13 = vld [vmem:[#allocation5 + $0x180] sm:$0xf]  ;;  %v3420_v14 = vor.u32 %v3709_v12, %v3419_v11  ;;  %1837 = vmatpush.bf16.msra.mxu2 %v3164_v10 }
  0x34   : > { %v3509_v15 = vld [vmem:[#allocation5 + $0x19c] sm:$0xf0]  ;;  %p3849_p3 = pneg %p3848_p2 }
  0x35   : > { %v2875_v16 = vld [vmem:[#allocation5 + $0x380] sm:$0xf]  ;;  %v2620_v18 = vor.u32 %v3509_v15, %v2619_v13  ;;  %1850 = vmatpush.bf16.msra.mxu3 %v3420_v14 }
  0x36   : > { %v3573_v17 = vld [vmem:[#allocation5 + $0x39c] sm:$0xf0]  ;;  %p3854_p9 = pnand %p3853_p8, %p3849_p3 }
  0x37   : > { %v2876_v19 = vor.u32 %v3573_v17, %v2875_v16  ;;  %v3131_v20 = vld [vmem:[#allocation5 + $0x580] sm:$0xf]  ;;  %1812 = vmatpush.bf16.msra.mxu0 %v2620_v18 }
  0x38   : > { %v3637_v21 = vld [vmem:[#allocation5 + $0x59c] sm:$0xf0] }
  0x39   : > { %v3387_v22 = vld [vmem:[#allocation5 + $0x780] sm:$0xf]  ;;  %v3132_v23 = vor.u32 %v3637_v21, %v3131_v20  ;;  %1825 = vmatpush.bf16.msra.mxu1 %v2876_v19 }
  0x3a   : > { %v3701_v24 = vld [vmem:[#allocation5 + $0x79c] sm:$0xf0] }
  0x3b   : > { %v2587_v25 = vld [vmem:[#allocation5 + $0x140] sm:$0xf]  ;;  %v3388_v27 = vor.u32 %v3701_v24, %v3387_v22  ;;  %1838 = vmatpush.bf16.msra.mxu2 %v3132_v23 }
  0x3c   : > { %v3501_v26 = vld [vmem:[#allocation5 + $0x15c] sm:$0xf0] }
  0x3d   : > { %v2843_v28 = vld [vmem:[#allocation5 + $0x340] sm:$0xf]  ;;  %v2588_v31 = vor.u32 %v3501_v26, %v2587_v25  ;;  %1851 = vmatpush.bf16.msra.mxu3 %v3388_v27 }
  0x3e   : > { %v3565_v29 = vld [vmem:[#allocation5 + $0x35c] sm:$0xf0] }
  0x3f   : > { %v3099_v30 = vld [vmem:[#allocation5 + $0x540] sm:$0xf]  ;;  %v2844_v35 = vor.u32 %v3565_v29, %v2843_v28  ;;  %1813 = vmatpush.bf16.msra.mxu0 %v2588_v31  ;;  %v2653_v31 = vld [vmem:[#allocation5 + $0x1e0] sm:$0xf0] }
  0x40   : > { %v3629_v32 = vld [vmem:[#allocation5 + $0x55c] sm:$0xf0] }
  0x41   : > { %v3355_v33 = vld [vmem:[#allocation5 + $0x740] sm:$0xf]  ;;  %v3100_v36 = vor.u32 %v3629_v32, %v3099_v30  ;;  %1826 = vmatpush.bf16.msra.mxu1 %v2844_v35  ;;  %v3513_v30 = vld [vmem:[#allocation5 + $0x1c4] sm:$0xf] }
  0x42   : > { %v3693_v34 = vld [vmem:[#allocation5 + $0x75c] sm:$0xf0]  ;;  %v3577_v32 = vld [vmem:[#allocation5 + $0x3c4] sm:$0xf] }
  0x43   : > { %v2555_v37 = vld [vmem:[#allocation5 + $0x100] sm:$0xf]  ;;  %v3356_v40 = vor.u32 %v3693_v34, %v3355_v33  ;;  %1839 = vmatpush.bf16.msra.mxu2 %v3100_v36  ;;  %v2909_v34 = vld [vmem:[#allocation5 + $0x3e0] sm:$0xf0] }
  0x44   : > { %v3493_v38 = vld [vmem:[#allocation5 + $0x11c] sm:$0xf0]  ;;  %v3641_v35 = vld [vmem:[#allocation5 + $0x5c4] sm:$0xf] }
  0x45   : > { %v2811_v39 = vld [vmem:[#allocation5 + $0x300] sm:$0xf]  ;;  %v2556_v46 = vor.u32 %v3493_v38, %v2555_v37  ;;  %1852 = vmatpush.bf16.msra.mxu3 %v3356_v40  ;;  %v3165_v36 = vld [vmem:[#allocation5 + $0x5e0] sm:$0xf0] }
  0x46   : > { %v3557_v41 = vld [vmem:[#allocation5 + $0x31c] sm:$0xf0]  ;;  %v3421_v40 = vld [vmem:[#allocation5 + $0x7e0] sm:$0xf0] }
  0x47   : > { %v3067_v42 = vld [vmem:[#allocation5 + $0x500] sm:$0xf]  ;;  %v2812_v47 = vor.u32 %v3557_v41, %v2811_v39  ;;  %1814 = vmatpush.bf16.msra.mxu0 %v2556_v46  ;;  %v3705_v39 = vld [vmem:[#allocation5 + $0x7c4] sm:$0xf] }
  0x48   : > { %v3621_v43 = vld [vmem:[#allocation5 + $0x51c] sm:$0xf0]  ;;  %v2621_v46 = vld [vmem:[#allocation5 + $0x1a0] sm:$0xf0] }
  0x49   : > { %v3323_v44 = vld [vmem:[#allocation5 + $0x700] sm:$0xf]  ;;  %v3068_v48 = vor.u32 %v3621_v43, %v3067_v42  ;;  %1827 = vmatpush.bf16.msra.mxu1 %v2812_v47  ;;  %v2656_v42 = vor.u32 %v3513_v30, %v2653_v31  ;;  %v2912_v43 = vor.u32 %v3577_v32, %v2909_v34  ;;  %v3569_v47 = vld [vmem:[#allocation5 + $0x384] sm:$0xf] }
  0x4a   : > { %v3685_v45 = vld [vmem:[#allocation5 + $0x71c] sm:$0xf0]  ;;  %v3609_v30 = vld [vmem:[#allocation5 + $0x4c4] sm:$0xf] }
  0x4b   : > { %v2523_v49 = vld [vmem:[#allocation5 + $0xc0] sm:$0xf]  ;;  %v3324_v52 = vor.u32 %v3685_v45, %v3323_v44  ;;  %1840 = vmatpush.bf16.msra.mxu2 %v3068_v48  ;;  %v3168_v44 = vor.u32 %v3641_v35, %v3165_v36  ;;  %v3505_v45 = vld [vmem:[#allocation5 + $0x184] sm:$0xf]  ;;  %v3424_v48 = vor.u32 %v3705_v39, %v3421_v40 }
  0x4c   : > { %v3485_v50 = vld [vmem:[#allocation5 + $0xdc] sm:$0xf0]  ;;  %v3037_v32 = vld [vmem:[#allocation5 + $0x4e0] sm:$0xf0] }
  0x4d   : > { %v2779_v51 = vld [vmem:[#allocation5 + $0x2c0] sm:$0xf]  ;;  %v2524_v58 = vor.u32 %v3485_v50, %v2523_v49  ;;  %1853 = vmatpush.bf16.msra.mxu3 %v3324_v52  ;;  %v2877_v49 = vld [vmem:[#allocation5 + $0x3a0] sm:$0xf0]  ;;  %v3040_v39 = vor.u32 %v3609_v30, %v3037_v32  ;;  %v3510_v30 = vld [vmem:[#allocation5 + $0x1a4] sm:$0xf0] }
  0x4e   : > { %v3549_v53 = vld [vmem:[#allocation5 + $0x2dc] sm:$0xf0]  ;;  %v3633_v50 = vld [vmem:[#allocation5 + $0x584] sm:$0xf] }
  0x4f   : > { %v3035_v54 = vld [vmem:[#allocation5 + $0x4c0] sm:$0xf]  ;;  %v2780_v59 = vor.u32 %v3549_v53, %v2779_v51  ;;  %1815 = vmatpush.bf16.msra.mxu0 %v2524_v58  ;;  %v3133_v51 = vld [vmem:[#allocation5 + $0x5a0] sm:$0xf0] }
  0x50   : > { %v3613_v55 = vld [vmem:[#allocation5 + $0x4dc] sm:$0xf0]  ;;  %v3697_v52 = vld [vmem:[#allocation5 + $0x784] sm:$0xf] }
  0x51   : > { %v3291_v56 = vld [vmem:[#allocation5 + $0x6c0] sm:$0xf]  ;;  %v3036_v60 = vor.u32 %v3613_v55, %v3035_v54  ;;  %1828 = vmatpush.bf16.msra.mxu1 %v2780_v59  ;;  %v3389_v53 = vld [vmem:[#allocation5 + $0x7a0] sm:$0xf0]  ;;  %v4013_v54 = vld [vmem:[#allocation2] sm:$0x3]  ;;  %v2624_v55 = vor.u32 %v3505_v45, %v2621_v46  ;;  %v2880_v59 = vor.u32 %v3569_v47, %v2877_v49 }
  0x52   : > { %v3677_v57 = vld [vmem:[#allocation5 + $0x6dc] sm:$0xf0]  ;;  %v240_v58 = vperm.slane %v4013_v54, 1  ;;  %v3673_v35 = vld [vmem:[#allocation5 + $0x6c4] sm:$0xf] }
  0x53   : > { %v2491_v61 = vld [vmem:[#allocation5 + $0x80] sm:$0xf]  ;;  %v3292_v0 = vor.u32 %v3677_v57, %v3291_v56  ;;  %1841 = vmatpush.bf16.msra.mxu2 %v3036_v60  ;;  %v3497_v56 = vld [vmem:[#allocation5 + $0x144] sm:$0xf]  ;;  %v239_v57 = vperm.slane %v4013_v54, 0  ;;  %v3136_v60 = vor.u32 %v3633_v50, %v3133_v51 }
  0x54   : > { %v3477_v62 = vld [vmem:[#allocation5 + $0x9c] sm:$0xf0]  ;;  %v3293_v36 = vld [vmem:[#allocation5 + $0x6e0] sm:$0xf0] }
  0x55   : > { %v2747_v63 = vld [vmem:[#allocation5 + $0x280] sm:$0xf]  ;;  %v2492_v6 = vor.u32 %v3477_v62, %v2491_v61  ;;  %1854 = vmatpush.bf16.msra.mxu3 %v3292_v0  ;;  %v2589_v61 = vld [vmem:[#allocation5 + $0x160] sm:$0xf0]  ;;  %v3392_v0 = vor.u32 %v3697_v52, %v3389_v53 }
  0x56   : > { %v3541_v1 = vld [vmem:[#allocation5 + $0x29c] sm:$0xf0]  ;;  %v3561_v62 = vld [vmem:[#allocation5 + $0x344] sm:$0xf] }
  0x57   : > { %v3003_v2 = vld [vmem:[#allocation5 + $0x480] sm:$0xf]  ;;  %v2748_v7 = vor.u32 %v3541_v1, %v2747_v63  ;;  %1816 = vmatpush.bf16.msra.mxu0 %v2492_v6  ;;  %v2845_v63 = vld [vmem:[#allocation5 + $0x360] sm:$0xf0] }
  0x58   : > { %v3605_v3 = vld [vmem:[#allocation5 + $0x49c] sm:$0xf0]  ;;  %v3625_v1 = vld [vmem:[#allocation5 + $0x544] sm:$0xf] }
  0x59   : > { %v3259_v4 = vld [vmem:[#allocation5 + $0x680] sm:$0xf]  ;;  %v3004_v8 = vor.u32 %v3605_v3, %v3003_v2  ;;  %1829 = vmatpush.bf16.msra.mxu1 %v2748_v7  ;;  %v3101_v2 = vld [vmem:[#allocation5 + $0x560] sm:$0xf0]  ;;  %v243_v3 = vpack.c.bf16 %v240_v58, %v239_v57  ;;  %v2592_v7 = vor.u32 %v3497_v56, %v2589_v61 }
  0x5a   : > { %v3669_v5 = vld [vmem:[#allocation5 + $0x69c] sm:$0xf0]  ;;  %v3357_v6 = vld [vmem:[#allocation5 + $0x760] sm:$0xf0] }
  0x5b   : > { %v2459_v9 = vld [vmem:[#allocation5 + $0x40] sm:$0xf]  ;;  %v3260_v12 = vor.u32 %v3669_v5, %v3259_v4  ;;  %1842 = vmatpush.bf16.msra.mxu2 %v3004_v8  ;;  %v236_v4 = vld [vmem:[%s4005_s21] sm:$0x3]  ;;  %v3689_v5 = vld [vmem:[#allocation5 + $0x744] sm:$0xf]  ;;  %v251_v8 = vunpack.c.l.b16 %v243_v3 }
  0x5c   : > { %v3469_v10 = vld [vmem:[#allocation5 + $0x5c] sm:$0xf0]  ;;  %245 = vst [vmem:[#allocation1] ss:$9 sm:$0xff] %v236_v4  ;;  %v3473_v40 = vld [vmem:[#allocation5 + $0x84] sm:$0xf] }
  0x5d   : > { %v2715_v11 = vld [vmem:[#allocation5 + $0x240] sm:$0xf]  ;;  %v2460_v18 = vor.u32 %v3469_v10, %v2459_v9  ;;  %1855 = vmatpush.bf16.msra.mxu3 %v3260_v12  ;;  %v252_v9 = vunpack.c.h.b16 %v243_v3  ;;  %v2848_v10 = vor.u32 %v3561_v62, %v2845_v63  ;;  %v3489_v12 = vld [vmem:[#allocation5 + $0x104] sm:$0xf] }
  0x5e   : > { %v3533_v13 = vld [vmem:[#allocation5 + $0x25c] sm:$0xf0]  ;;  %v3601_v45 = vld [vmem:[#allocation5 + $0x484] sm:$0xf] }
  0x5f   : > { %v2971_v14 = vld [vmem:[#allocation5 + $0x440] sm:$0xf]  ;;  %v2716_v21 = vor.u32 %v3533_v13, %v2715_v11  ;;  %1817 = vmatpush.bf16.msra.mxu0 %v2460_v18  ;;  %v3104_v11 = vor.u32 %v3625_v1, %v3101_v2  ;;  %v2557_v13 = vld [vmem:[#allocation5 + $0x120] sm:$0xf0] }
  0x60   : > { %v3597_v15 = vld [vmem:[#allocation5 + $0x45c] sm:$0xf0]  ;;  %v3069_v18 = vld [vmem:[#allocation5 + $0x520] sm:$0xf0] }
  0x61   : > { %v3227_v16 = vld [vmem:[#allocation5 + $0x640] sm:$0xf]  ;;  %v2972_v22 = vor.u32 %v3597_v15, %v2971_v14  ;;  %1830 = vmatpush.bf16.msra.mxu1 %v2716_v21  ;;  %v3553_v14 = vld [vmem:[#allocation5 + $0x304] sm:$0xf]  ;;  %v3360_v15 = vor.u32 %v3689_v5, %v3357_v6 }
  0x62   : > { %v3661_v17 = vld [vmem:[#allocation5 + $0x65c] sm:$0xf0]  ;;  %v3325_v21 = vld [vmem:[#allocation5 + $0x720] sm:$0xf0] }
  0x63   : > { %v2427_v19 = vld [vmem:[#allocation5] sm:$0xf]  ;;  %v3228_v26 = vor.u32 %v3661_v17, %v3227_v16  ;;  %1843 = vmatpush.bf16.msra.mxu2 %v2972_v22  ;;  %v2813_v16 = vld [vmem:[#allocation5 + $0x320] sm:$0xf0]  ;;  %v4024_v22 = vpack.c.b16 %v252_v9, %v252_v9 }
  0x64   : > { %v3461_v20 = vld [vmem:[#allocation5 + $0x1c] sm:$0xf0]  ;;  %v3617_v17 = vld [vmem:[#allocation5 + $0x504] sm:$0xf] }
  0x65   : > { %v2683_v23 = vld [vmem:[#allocation5 + $0x200] sm:$0xf]  ;;  %v2428_v33 = vor.u32 %v3461_v20, %v2427_v19  ;;  %1856 = vmatpush.bf16.msra.mxu3 %v3228_v26  ;;  %v4022_v19 = vpack.c.b16 %v251_v8, %v251_v8  ;;  %v3681_v20 = vld [vmem:[#allocation5 + $0x704] sm:$0xf]  ;;  %v2816_v26 = vor.u32 %v3553_v14, %v2813_v16  ;;  %v2915_v14 = vld [vmem:[#allocation5 + $0x3c8] sm:$0xf] }
  0x66   : > { %v3525_v24 = vld [vmem:[#allocation5 + $0x21c] sm:$0xf0]  ;;  %v3328_v31 = vor.u32 %v3681_v20, %v3325_v21  ;;  %v3005_v46 = vld [vmem:[#allocation5 + $0x4a0] sm:$0xf0]  ;;  %v3582_v16 = vld [vmem:[#allocation5 + $0x3e4] sm:$0xf0] }
  0x67   : > { %v2939_v25 = vld [vmem:[#allocation5 + $0x400] sm:$0xf]  ;;  %v2684_v37 = vor.u32 %v3525_v24, %v2683_v23  ;;  %1818 = vmatpush.bf16.msra.mxu0 %v2428_v33  ;;  %v2560_v23 = vor.u32 %v3489_v12, %v2557_v13  ;;  %v3481_v24 = vld [vmem:[#allocation5 + $0xc4] sm:$0xf]  ;;  %v4027_v33 = vld [vmem:[#allocation1] sm:$0xff]  ;;  %v3008_v51 = vor.u32 %v3601_v45, %v3005_v46 }
  0x68   : > { %v3589_v27 = vld [vmem:[#allocation5 + $0x41c] sm:$0xf0]  ;;  %v3665_v47 = vld [vmem:[#allocation5 + $0x684] sm:$0xf]  ;;  %v2659_v12 = vld [vmem:[#allocation5 + $0x1c8] sm:$0xf] }
  0x69   : > { %v3195_v28 = vld [vmem:[#allocation5 + $0x600] sm:$0xf]  ;;  %v2940_v38 = vor.u32 %v3589_v27, %v2939_v25  ;;  %1831 = vmatpush.bf16.msra.mxu1 %v2684_v37  ;;  %v2525_v25 = vld [vmem:[#allocation5 + $0xe0] sm:$0xf0]  ;;  %v3072_v27 = vor.u32 %v3617_v17, %v3069_v18  ;;  %v3518_v13 = vld [vmem:[#allocation5 + $0x1e4] sm:$0xf0] }
  0x6a   : > { %v3653_v29 = vld [vmem:[#allocation5 + $0x61c] sm:$0xf0]  ;;  %1819 = vmatmul.bf16.vlgmr.msra.gmra.mxu0 %v4027_v33  ;;  %v2528_v37 = vor.u32 %v3481_v24, %v2525_v25  ;;  %v3465_v52 = vld [vmem:[#allocation5 + $0x44] sm:$0xf]  ;;  %v3171_v17 = vld [vmem:[#allocation5 + $0x5c8] sm:$0xf] }
  0x6b   : > { %v3196_v41 = vor.u32 %v3653_v29, %v3195_v28  ;;  %1844 = vmatpush.bf16.msra.mxu2 %v2940_v38  ;;  %1863 = vmatpush.bf16.msrb.mxu0 %v2656_v42  ;;  %v3545_v28 = vld [vmem:[#allocation5 + $0x2c4] sm:$0xf]  ;;  %v3646_v18 = vld [vmem:[#allocation5 + $0x5e4] sm:$0xf0] }
  0x6c   : > { %v2781_v29 = vld [vmem:[#allocation5 + $0x2e0] sm:$0xf0]  ;;  %v3710_v24 = vld [vmem:[#allocation5 + $0x7e4] sm:$0xf0] }
  0x6d   : > { %1857 = vmatpush.bf16.msra.mxu3 %v3196_v41  ;;  %1876 = vmatpush.bf16.msrb.mxu1 %v2912_v43  ;;  %v4029_v34 = vld [vmem:[#allocation1 + $0x9] sm:$0xff]  ;;  %v2784_v38 = vor.u32 %v3545_v28, %v2781_v29  ;;  %v3296_v43 = vor.u32 %v3673_v35, %v3293_v36  ;;  %v3172_v28 = vor.u32 %v3646_v18, %v3171_v17  ;;  %v2627_v29 = vld [vmem:[#allocation5 + $0x188] sm:$0xf] }
  0x6e   : > { %1845 = vmatmul.bf16.vlgmr.msra.gmra.mxu2 %v4022_v19  ;;  %1832 = vmatmul.bf16.vlgmr.msra.gmra.mxu1 %v4029_v34  ;;  %v2493_v41 = vld [vmem:[#allocation5 + $0xa0] sm:$0xf0]  ;;  %v3574_v35 = vld [vmem:[#allocation5 + $0x3a4] sm:$0xf0] }
  0x6f   : > { %1889 = vmatpush.bf16.msrb.mxu2 %v3168_v44  ;;  %1864 = vmatpush.bf16.msrb.mxu0 %v2624_v55  ;;  %v3537_v42 = vld [vmem:[#allocation5 + $0x284] sm:$0xf]  ;;  %v2496_v49 = vor.u32 %v3473_v40, %v2493_v41  ;;  %v3139_v36 = vld [vmem:[#allocation5 + $0x588] sm:$0xf]  ;;  %v2628_v40 = vor.u32 %v3510_v30, %v2627_v29 }
  0x70   : > { %1858 = vmatmul.bf16.vlgmr.msra.gmra.mxu3 %v4024_v22  ;;  %v2749_v44 = vld [vmem:[#allocation5 + $0x2a0] sm:$0xf0]  ;;  %v2851_v45 = vld [vmem:[#allocation5 + $0x348] sm:$0xf] }
  0x71   : > { %1902 = vmatpush.bf16.msrb.mxu3 %v3424_v48  ;;  %1877 = vmatpush.bf16.msrb.mxu1 %v2880_v59  ;;  %v3261_v48 = vld [vmem:[#allocation5 + $0x6a0] sm:$0xf0]  ;;  %v2752_v50 = vor.u32 %v3537_v42, %v2749_v44  ;;  %v3502_v44 = vld [vmem:[#allocation5 + $0x164] sm:$0xf0] }
  0x72   : > { %v2461_v53 = vld [vmem:[#allocation5 + $0x60] sm:$0xf0]  ;;  %v3264_v56 = vor.u32 %v3665_v47, %v3261_v48  ;;  %v3566_v47 = vld [vmem:[#allocation5 + $0x364] sm:$0xf0] }
  0x73   : > { %1890 = vmatpush.bf16.msrb.mxu2 %v3136_v60  ;;  %1865 = vmatpush.bf16.msrb.mxu0 %v2592_v7  ;;  %v3529_v55 = vld [vmem:[#allocation5 + $0x244] sm:$0xf]  ;;  %v3107_v48 = vld [vmem:[#allocation5 + $0x548] sm:$0xf] }
  0x74   : > { %v2717_v59 = vld [vmem:[#allocation5 + $0x260] sm:$0xf0]  ;;  %v2499_v18 = vld [vmem:[#allocation5 + $0x88] sm:$0xf] }
  0x75   : > { %1903 = vmatpush.bf16.msrb.mxu3 %v3392_v0  ;;  %1878 = vmatpush.bf16.msrb.mxu1 %v2848_v10  ;;  %v3593_v60 = vld [vmem:[#allocation5 + $0x444] sm:$0xf]  ;;  %v2464_v0 = vor.u32 %v3465_v52, %v2461_v53  ;;  %v2720_v3 = vor.u32 %v3529_v55, %v2717_v59  ;;  %v2852_v53 = vor.u32 %v3566_v47, %v2851_v45  ;;  %v3494_v59 = vld [vmem:[#allocation5 + $0x124] sm:$0xf0] }
  0x76   : > { %v2973_v61 = vld [vmem:[#allocation5 + $0x460] sm:$0xf0]  ;;  %v3462_v45 = vld [vmem:[#allocation5 + $0x24] sm:$0xf0] }
  0x77   : > { %1891 = vmatpush.bf16.msrb.mxu2 %v3104_v11  ;;  %1866 = vmatpush.bf16.msrb.mxu0 %v2560_v23  ;;  %v3657_v62 = vld [vmem:[#allocation5 + $0x644] sm:$0xf]  ;;  %v2976_v4 = vor.u32 %v3593_v60, %v2973_v61  ;;  %v3427_v23 = vld [vmem:[#allocation5 + $0x7c8] sm:$0xf] }
  0x78   : > { %v3229_v63 = vld [vmem:[#allocation5 + $0x660] sm:$0xf0]  ;;  %v3428_v32 = vor.u32 %v3710_v24, %v3427_v23  ;;  %v2819_v60 = vld [vmem:[#allocation5 + $0x308] sm:$0xf] }
  0x79   : > { %1904 = vmatpush.bf16.msrb.mxu3 %v3360_v15  ;;  %1879 = vmatpush.bf16.msrb.mxu1 %v2816_v26  ;;  %v3457_v1 = vld [vmem:[#allocation5 + $0x4] sm:$0xf]  ;;  %v3232_v8 = vor.u32 %v3657_v62, %v3229_v63  ;;  %v2660_v26 = vor.u32 %v3518_v13, %v2659_v12  ;;  %v3558_v62 = vld [vmem:[#allocation5 + $0x324] sm:$0xf0] }
  0x7a   : > { %v2429_v2 = vld [vmem:[#allocation5 + $0x20] sm:$0xf0]  ;;  %v3075_v63 = vld [vmem:[#allocation5 + $0x508] sm:$0xf] }
  0x7b   : > { %1892 = vmatpush.bf16.msrb.mxu2 %v3072_v27  ;;  %1867 = vmatpush.bf16.msrb.mxu0 %v2528_v37  ;;  %v3521_v5 = vld [vmem:[#allocation5 + $0x204] sm:$0xf]  ;;  %v2432_v15 = vor.u32 %v3457_v1, %v2429_v2  ;;  %v2916_v27 = vor.u32 %v3582_v16, %v2915_v14  ;;  %v3638_v37 = vld [vmem:[#allocation5 + $0x5a4] sm:$0xf0] }
  0x7c   : > { %v2685_v6 = vld [vmem:[#allocation5 + $0x220] sm:$0xf0]  ;;  %v3140_v42 = vor.u32 %v3638_v37, %v3139_v36  ;;  %v3331_v1 = vld [vmem:[#allocation5 + $0x708] sm:$0xf] }
  0x7d   : > { %1905 = vmatpush.bf16.msrb.mxu3 %v3328_v31  ;;  %1880 = vmatpush.bf16.msrb.mxu1 %v2784_v38  ;;  %v3585_v7 = vld [vmem:[#allocation5 + $0x404] sm:$0xf]  ;;  %v2688_v20 = vor.u32 %v3521_v5, %v2685_v6  ;;  %v2883_v31 = vld [vmem:[#allocation5 + $0x388] sm:$0xf] }
  0x7e   : > { %v2941_v9 = vld [vmem:[#allocation5 + $0x420] sm:$0xf0]  ;;  %v3395_v38 = vld [vmem:[#allocation5 + $0x788] sm:$0xf]  ;;  %v2884_v41 = vor.u32 %v3574_v35, %v2883_v31 }
  0x7f   : > { %1893 = vmatpush.bf16.msrb.mxu2 %v3040_v39  ;;  %1868 = vmatpush.bf16.msrb.mxu0 %v2496_v49  ;;  %v3649_v10 = vld [vmem:[#allocation5 + $0x604] sm:$0xf]  ;;  %v2944_v21 = vor.u32 %v3585_v7, %v2941_v9  ;;  %v3702_v39 = vld [vmem:[#allocation5 + $0x7a4] sm:$0xf0] }
  0x80   : > { %v3197_v11 = vld [vmem:[#allocation5 + $0x620] sm:$0xf0]  ;;  %v3396_v46 = vor.u32 %v3702_v39, %v3395_v38  ;;  %v3630_v49 = vld [vmem:[#allocation5 + $0x564] sm:$0xf0] }
  0x81   : > { %1906 = vmatpush.bf16.msrb.mxu3 %v3296_v43  ;;  %1881 = vmatpush.bf16.msrb.mxu1 %v2752_v50  ;;  %v3200_v25 = vor.u32 %v3649_v10, %v3197_v11  ;;  %v2595_v43 = vld [vmem:[#allocation5 + $0x148] sm:$0xf]  ;;  %v3108_v55 = vor.u32 %v3630_v49, %v3107_v48 }
  0x82   : > { %v3363_v50 = vld [vmem:[#allocation5 + $0x748] sm:$0xf]  ;;  %v2596_v52 = vor.u32 %v3502_v44, %v2595_v43 }
  0x83   : > { %1894 = vmatpush.bf16.msrb.mxu2 %v3008_v51  ;;  %1869 = vmatpush.bf16.msrb.mxu0 %v2464_v0  ;;  %v3694_v51 = vld [vmem:[#allocation5 + $0x764] sm:$0xf0] }
  0x84   : > { %v3364_v61 = vor.u32 %v3694_v51, %v3363_v50  ;;  %v3622_v0 = vld [vmem:[#allocation5 + $0x524] sm:$0xf0] }
  0x85   : > { %1907 = vmatpush.bf16.msrb.mxu3 %v3264_v56  ;;  %1882 = vmatpush.bf16.msrb.mxu1 %v2720_v3  ;;  %v2563_v56 = vld [vmem:[#allocation5 + $0x108] sm:$0xf]  ;;  %v3076_v5 = vor.u32 %v3622_v0, %v3075_v63  ;;  %v3642_v63 = vld [vmem:[#allocation5 + $0x5cc] sm:$0xf] }
  0x86   : > { %v3686_v2 = vld [vmem:[#allocation5 + $0x724] sm:$0xf0]  ;;  %v2564_v3 = vor.u32 %v3494_v59, %v2563_v56  ;;  %v3514_v56 = vld [vmem:[#allocation5 + $0x1cc] sm:$0xf] }
  0x87   : > { %1895 = vmatpush.bf16.msrb.mxu2 %v2976_v4  ;;  %1870 = vmatpush.bf16.msrb.mxu0 %v2432_v15  ;;  %v2820_v4 = vor.u32 %v3558_v62, %v2819_v60  ;;  %v2531_v6 = vld [vmem:[#allocation5 + $0xc8] sm:$0xf]  ;;  %v3332_v9 = vor.u32 %v3686_v2, %v3331_v1  ;;  %v2661_v59 = vld [vmem:[#allocation5 + $0x1e8] sm:$0xf0] }
  0x88   : > { %v3486_v7 = vld [vmem:[#allocation5 + $0xe4] sm:$0xf0]  ;;  %v3578_v60 = vld [vmem:[#allocation5 + $0x3cc] sm:$0xf] }
  0x89   : > { %1908 = vmatpush.bf16.msrb.mxu3 %v3232_v8  ;;  %1883 = vmatpush.bf16.msrb.mxu1 %v2688_v20  ;;  %v2787_v8 = vld [vmem:[#allocation5 + $0x2c8] sm:$0xf]  ;;  %v2532_v15 = vor.u32 %v3486_v7, %v2531_v6  ;;  %v2917_v62 = vld [vmem:[#allocation5 + $0x3e8] sm:$0xf0]  ;;  %v2664_v6 = vor.u32 %v3514_v56, %v2661_v59 }
  0x8a   : > { %1871 = vmatmul.bf16.vlgmr.msrb.gmra.mxu0 %v4027_v33  ;;  %v3550_v10 = vld [vmem:[#allocation5 + $0x2e4] sm:$0xf0]  ;;  %v3173_v0 = vld [vmem:[#allocation5 + $0x5e8] sm:$0xf0]  ;;  %v2920_v7 = vor.u32 %v3578_v60, %v2917_v62 }
  0x8b   : > { %1896 = vmatpush.bf16.msrb.mxu2 %v2944_v21  ;;  %1915 = vmatpush.bf16.msra.mxu0 %v2660_v26  ;;  %v3043_v11 = vld [vmem:[#allocation5 + $0x4c8] sm:$0xf]  ;;  %v2788_v16 = vor.u32 %v3550_v10, %v2787_v8  ;;  %v3176_v8 = vor.u32 %v3642_v63, %v3173_v0  ;;  %v2629_v10 = vld [vmem:[#allocation5 + $0x1a8] sm:$0xf0] }
  0x8c   : > { %1884 = vmatmul.bf16.vlgmr.msrb.gmra.mxu1 %v4029_v34  ;;  %v3614_v12 = vld [vmem:[#allocation5 + $0x4e4] sm:$0xf0]  ;;  %v3045_v56 = vld [vmem:[#allocation5 + $0x4e8] sm:$0xf0] }
  0x8d   : > { %1909 = vmatpush.bf16.msrb.mxu3 %v3200_v25  ;;  %1928 = vmatpush.bf16.msra.mxu1 %v2916_v27  ;;  %v3299_v13 = vld [vmem:[#allocation5 + $0x6c8] sm:$0xf]  ;;  %v3044_v17 = vor.u32 %v3614_v12, %v3043_v11  ;;  %v3570_v11 = vld [vmem:[#allocation5 + $0x38c] sm:$0xf] }
  0x8e   : > { %1897 = vmatmul.bf16.vlgmr.msrb.gmra.mxu2 %v4022_v19  ;;  %v3678_v14 = vld [vmem:[#allocation5 + $0x6e4] sm:$0xf0]  ;;  %v3674_v59 = vld [vmem:[#allocation5 + $0x6cc] sm:$0xf] }
  0x8f   : > { %1941 = vmatpush.bf16.msra.mxu2 %v3172_v28  ;;  %1916 = vmatpush.bf16.msra.mxu0 %v2628_v40  ;;  %v3478_v20 = vld [vmem:[#allocation5 + $0xa4] sm:$0xf0]  ;;  %v3300_v23 = vor.u32 %v3678_v14, %v3299_v13  ;;  %v2885_v13 = vld [vmem:[#allocation5 + $0x3a8] sm:$0xf0] }
  0x90   : > { %1910 = vmatmul.bf16.vlgmr.msrb.gmra.mxu3 %v4024_v22  ;;  %v2755_v21 = vld [vmem:[#allocation5 + $0x288] sm:$0xf]  ;;  %v2500_v29 = vor.u32 %v3478_v20, %v2499_v18  ;;  %v3634_v14 = vld [vmem:[#allocation5 + $0x58c] sm:$0xf]  ;;  %v2888_v20 = vor.u32 %v3570_v11, %v2885_v13 }
  0x91   : > { %1954 = vmatpush.bf16.msra.mxu3 %v3428_v32  ;;  %1929 = vmatpush.bf16.msra.mxu1 %v2884_v41  ;;  %v3542_v24 = vld [vmem:[#allocation5 + $0x2a4] sm:$0xf0]  ;;  %v3301_v60 = vld [vmem:[#allocation5 + $0x6e8] sm:$0xf0] }
  0x92   : > { %v3011_v25 = vld [vmem:[#allocation5 + $0x488] sm:$0xf]  ;;  %v2756_v30 = vor.u32 %v3542_v24, %v2755_v21  ;;  %v2597_v24 = vld [vmem:[#allocation5 + $0x168] sm:$0xf0] }
  0x93   : > { %1942 = vmatpush.bf16.msra.mxu2 %v3140_v42  ;;  %1917 = vmatpush.bf16.msra.mxu0 %v2596_v52  ;;  %v3606_v26 = vld [vmem:[#allocation5 + $0x4a4] sm:$0xf0]  ;;  %v3474_v0 = vld [vmem:[#allocation5 + $0x8c] sm:$0xf] }
  0x94   : > { %v3267_v27 = vld [vmem:[#allocation5 + $0x688] sm:$0xf]  ;;  %v3012_v31 = vor.u32 %v3606_v26, %v3011_v25  ;;  %v3562_v25 = vld [vmem:[#allocation5 + $0x34c] sm:$0xf] }
  0x95   : > { %1955 = vmatpush.bf16.msra.mxu3 %v3396_v46  ;;  %1930 = vmatpush.bf16.msra.mxu1 %v2852_v53  ;;  %v3670_v28 = vld [vmem:[#allocation5 + $0x6a4] sm:$0xf0]  ;;  %v2469_v13 = vld [vmem:[#allocation5 + $0x68] sm:$0xf0] }
  0x96   : > { %v2467_v32 = vld [vmem:[#allocation5 + $0x48] sm:$0xf]  ;;  %v3268_v37 = vor.u32 %v3670_v28, %v3267_v27  ;;  %v2853_v27 = vld [vmem:[#allocation5 + $0x368] sm:$0xf0] }
  0x97   : > { %1943 = vmatpush.bf16.msra.mxu2 %v3108_v55  ;;  %1918 = vmatpush.bf16.msra.mxu0 %v2564_v3  ;;  %v3470_v35 = vld [vmem:[#allocation5 + $0x64] sm:$0xf0]  ;;  %v3706_v3 = vld [vmem:[#allocation5 + $0x7cc] sm:$0xf] }
  0x98   : > { %v2723_v36 = vld [vmem:[#allocation5 + $0x248] sm:$0xf]  ;;  %v2468_v43 = vor.u32 %v3470_v35, %v2467_v32  ;;  %v3626_v28 = vld [vmem:[#allocation5 + $0x54c] sm:$0xf]  ;;  %v2856_v35 = vor.u32 %v3562_v25, %v2853_v27 }
  0x99   : > { %1956 = vmatpush.bf16.msra.mxu3 %v3364_v61  ;;  %1931 = vmatpush.bf16.msra.mxu1 %v2820_v4  ;;  %v3534_v38 = vld [vmem:[#allocation5 + $0x264] sm:$0xf0]  ;;  %v3429_v4 = vld [vmem:[#allocation5 + $0x7e8] sm:$0xf0] }
  0x9a   : > { %v2979_v39 = vld [vmem:[#allocation5 + $0x448] sm:$0xf]  ;;  %v2724_v46 = vor.u32 %v3534_v38, %v2723_v36  ;;  %v3432_v12 = vor.u32 %v3706_v3, %v3429_v4  ;;  %v2565_v38 = vld [vmem:[#allocation5 + $0x128] sm:$0xf0]  ;;  %v3304_v3 = vor.u32 %v3674_v59, %v3301_v60  ;;  %v3575_v59 = vld [vmem:[#allocation5 + $0x3ac] sm:$0xf0] }
  0x9b   : > { %1944 = vmatpush.bf16.msra.mxu2 %v3076_v5  ;;  %1919 = vmatpush.bf16.msra.mxu0 %v2532_v15  ;;  %v3598_v40 = vld [vmem:[#allocation5 + $0x464] sm:$0xf0]  ;;  %v3141_v15 = vld [vmem:[#allocation5 + $0x5a8] sm:$0xf0]  ;;  %v3147_v60 = vld [vmem:[#allocation5 + $0x590] sm:$0xf] }
  0x9c   : > { %v3235_v41 = vld [vmem:[#allocation5 + $0x648] sm:$0xf]  ;;  %v2980_v47 = vor.u32 %v3598_v40, %v2979_v39  ;;  %v3144_v21 = vor.u32 %v3634_v14, %v3141_v15  ;;  %v3554_v39 = vld [vmem:[#allocation5 + $0x30c] sm:$0xf] }
  0x9d   : > { %1957 = vmatpush.bf16.msra.mxu3 %v3332_v9  ;;  %1932 = vmatpush.bf16.msra.mxu1 %v2788_v16  ;;  %v3662_v42 = vld [vmem:[#allocation5 + $0x664] sm:$0xf0]  ;;  %v3506_v9 = vld [vmem:[#allocation5 + $0x18c] sm:$0xf] }
  0x9e   : > { %v2435_v44 = vld [vmem:[#allocation5 + $0x8] sm:$0xf]  ;;  %v3236_v51 = vor.u32 %v3662_v42, %v3235_v41  ;;  %v3698_v16 = vld [vmem:[#allocation5 + $0x78c] sm:$0xf]  ;;  %v2632_v18 = vor.u32 %v3506_v9, %v2629_v10 }
  0x9f   : > { %1945 = vmatpush.bf16.msra.mxu2 %v3044_v17  ;;  %1920 = vmatpush.bf16.msra.mxu0 %v2500_v29  ;;  %v2691_v48 = vld [vmem:[#allocation5 + $0x208] sm:$0xf]  ;;  %v2436_v61 = vor.u32 %v3462_v45, %v2435_v44  ;;  %v3397_v17 = vld [vmem:[#allocation5 + $0x7a8] sm:$0xf0] }
  0xa0   : > { %v3526_v49 = vld [vmem:[#allocation5 + $0x224] sm:$0xf0]  ;;  %v3400_v26 = vor.u32 %v3698_v16, %v3397_v17  ;;  %v3109_v29 = vld [vmem:[#allocation5 + $0x568] sm:$0xf0] }
  0xa1   : > { %1958 = vmatpush.bf16.msra.mxu3 %v3300_v23  ;;  %1933 = vmatpush.bf16.msra.mxu1 %v2756_v30  ;;  %v2947_v50 = vld [vmem:[#allocation5 + $0x408] sm:$0xf]  ;;  %v2692_v1 = vor.u32 %v3526_v49, %v2691_v48  ;;  %v3498_v23 = vld [vmem:[#allocation5 + $0x14c] sm:$0xf]  ;;  %v3112_v36 = vor.u32 %v3626_v28, %v3109_v29 }
  0xa2   : > { %v3590_v52 = vld [vmem:[#allocation5 + $0x424] sm:$0xf0]  ;;  %v3690_v30 = vld [vmem:[#allocation5 + $0x74c] sm:$0xf]  ;;  %v2600_v32 = vor.u32 %v3498_v23, %v2597_v24 }
  0xa3   : > { %1946 = vmatpush.bf16.msra.mxu2 %v3012_v31  ;;  %v3203_v53 = vld [vmem:[#allocation5 + $0x608] sm:$0xf]  ;;  %1921 = vmatpush.bf16.msra.mxu0 %v2468_v43  ;;  %v2948_v2 = vor.u32 %v3590_v52, %v2947_v50  ;;  %v3365_v31 = vld [vmem:[#allocation5 + $0x768] sm:$0xf0] }
  0xa4   : > { %v3654_v55 = vld [vmem:[#allocation5 + $0x624] sm:$0xf0]  ;;  %v3368_v40 = vor.u32 %v3690_v30, %v3365_v31  ;;  %v2821_v41 = vld [vmem:[#allocation5 + $0x328] sm:$0xf0] }
  0xa5   : > { %1959 = vmatpush.bf16.msra.mxu3 %v3268_v37  ;;  %1934 = vmatpush.bf16.msra.mxu1 %v2724_v46  ;;  %v3204_v5 = vor.u32 %v3654_v55, %v3203_v53  ;;  %v3490_v37 = vld [vmem:[#allocation5 + $0x10c] sm:$0xf] }
  0xa6   : > { %v3618_v42 = vld [vmem:[#allocation5 + $0x50c] sm:$0xf]  ;;  %v2568_v46 = vor.u32 %v3490_v37, %v2565_v38  ;;  %v2667_v37 = vld [vmem:[#allocation5 + $0x1d0] sm:$0xf] }
  0xa7   : > { %1947 = vmatpush.bf16.msra.mxu2 %v2980_v47  ;;  %1922 = vmatpush.bf16.msra.mxu0 %v2436_v61  ;;  %v3077_v43 = vld [vmem:[#allocation5 + $0x528] sm:$0xf0]  ;;  %v2824_v47 = vor.u32 %v3554_v39, %v2821_v41  ;;  %v3519_v38 = vld [vmem:[#allocation5 + $0x1ec] sm:$0xf0] }
  0xa8   : > { %v3682_v44 = vld [vmem:[#allocation5 + $0x70c] sm:$0xf]  ;;  %v3080_v48 = vor.u32 %v3618_v42, %v3077_v43  ;;  %v2923_v39 = vld [vmem:[#allocation5 + $0x3d0] sm:$0xf] }
  0xa9   : > { %1960 = vmatpush.bf16.msra.mxu3 %v3236_v51  ;;  %1935 = vmatpush.bf16.msra.mxu1 %v2692_v1  ;;  %v3333_v45 = vld [vmem:[#allocation5 + $0x728] sm:$0xf0]  ;;  %v3583_v41 = vld [vmem:[#allocation5 + $0x3ec] sm:$0xf0] }
  0xaa   : > { %1923 = vmatmul.bf16.vlgmr.msra.gmra.mxu0 %v4027_v33  ;;  %v3482_v49 = vld [vmem:[#allocation5 + $0xcc] sm:$0xf]  ;;  %v3336_v52 = vor.u32 %v3682_v44, %v3333_v45  ;;  %v3179_v42 = vld [vmem:[#allocation5 + $0x5d0] sm:$0xf] }
  0xab   : > { %1948 = vmatpush.bf16.msra.mxu2 %v2948_v2  ;;  %1967 = vmatpush.bf16.msrb.mxu0 %v2664_v6  ;;  %v2533_v50 = vld [vmem:[#allocation5 + $0xe8] sm:$0xf0]  ;;  %v3647_v43 = vld [vmem:[#allocation5 + $0x5ec] sm:$0xf0] }
  0xac   : > { %1936 = vmatmul.bf16.vlgmr.msra.gmra.mxu1 %v4029_v34  ;;  %v3546_v51 = vld [vmem:[#allocation5 + $0x2cc] sm:$0xf]  ;;  %v2536_v61 = vor.u32 %v3482_v49, %v2533_v50  ;;  %v2668_v49 = vor.u32 %v3519_v38, %v2667_v37  ;;  %v2924_v50 = vor.u32 %v3583_v41, %v2923_v39  ;;  %v3615_v37 = vld [vmem:[#allocation5 + $0x4ec] sm:$0xf0] }
  0xad   : > { %1961 = vmatpush.bf16.msra.mxu3 %v3204_v5  ;;  %1980 = vmatpush.bf16.msrb.mxu1 %v2920_v7  ;;  %v2789_v53 = vld [vmem:[#allocation5 + $0x2e8] sm:$0xf0]  ;;  %v3307_v38 = vld [vmem:[#allocation5 + $0x6d0] sm:$0xf] }
  0xae   : > { %1949 = vmatmul.bf16.vlgmr.msra.gmra.mxu2 %v4022_v19  ;;  %v3610_v55 = vld [vmem:[#allocation5 + $0x4cc] sm:$0xf]  ;;  %v2792_v62 = vor.u32 %v3546_v51, %v2789_v53  ;;  %v3180_v51 = vor.u32 %v3647_v43, %v3179_v42  ;;  %v3511_v53 = vld [vmem:[#allocation5 + $0x1ac] sm:$0xf0] }
  0xaf   : > { %1993 = vmatpush.bf16.msrb.mxu2 %v3176_v8  ;;  %1968 = vmatpush.bf16.msrb.mxu0 %v2632_v18  ;;  %v3048_v63 = vor.u32 %v3610_v55, %v3045_v56  ;;  %v2501_v1 = vld [vmem:[#allocation5 + $0xa8] sm:$0xf0]  ;;  %v2891_v55 = vld [vmem:[#allocation5 + $0x390] sm:$0xf] }
  0xb0   : > { %1962 = vmatmul.bf16.vlgmr.msra.gmra.mxu3 %v4024_v22  ;;  %v3538_v2 = vld [vmem:[#allocation5 + $0x28c] sm:$0xf]  ;;  %v2504_v9 = vor.u32 %v3474_v0, %v2501_v1  ;;  %v2892_v1 = vor.u32 %v3575_v59, %v2891_v55  ;;  %v3679_v39 = vld [vmem:[#allocation5 + $0x6ec] sm:$0xf0] }
  0xb1   : > { %2006 = vmatpush.bf16.msrb.mxu3 %v3432_v12  ;;  %1981 = vmatpush.bf16.msrb.mxu1 %v2888_v20  ;;  %v2757_v4 = vld [vmem:[#allocation5 + $0x2a8] sm:$0xf0]  ;;  %v2507_v43 = vld [vmem:[#allocation5 + $0x90] sm:$0xf] }
  0xb2   : > { %v3602_v5 = vld [vmem:[#allocation5 + $0x48c] sm:$0xf]  ;;  %v2760_v10 = vor.u32 %v3538_v2, %v2757_v4  ;;  %v3503_v4 = vld [vmem:[#allocation5 + $0x16c] sm:$0xf0] }
  0xb3   : > { %1994 = vmatpush.bf16.msrb.mxu2 %v3144_v21  ;;  %1969 = vmatpush.bf16.msrb.mxu0 %v2600_v32  ;;  %v3013_v6 = vld [vmem:[#allocation5 + $0x4a8] sm:$0xf0]  ;;  %v3471_v59 = vld [vmem:[#allocation5 + $0x6c] sm:$0xf0] }
  0xb4   : > { %v3666_v7 = vld [vmem:[#allocation5 + $0x68c] sm:$0xf]  ;;  %v3016_v11 = vor.u32 %v3602_v5, %v3013_v6  ;;  %v2859_v5 = vld [vmem:[#allocation5 + $0x350] sm:$0xf] }
  0xb5   : > { %2007 = vmatpush.bf16.msrb.mxu3 %v3400_v26  ;;  %1982 = vmatpush.bf16.msrb.mxu1 %v2856_v35  ;;  %v3269_v8 = vld [vmem:[#allocation5 + $0x6a8] sm:$0xf0] }
  0xb6   : > { %v3466_v12 = vld [vmem:[#allocation5 + $0x4c] sm:$0xf]  ;;  %v3272_v15 = vor.u32 %v3666_v7, %v3269_v8  ;;  %v3567_v7 = vld [vmem:[#allocation5 + $0x36c] sm:$0xf0] }
  0xb7   : > { %1995 = vmatpush.bf16.msrb.mxu2 %v3112_v36  ;;  %1970 = vmatpush.bf16.msrb.mxu0 %v2568_v46  ;;  %v3530_v14 = vld [vmem:[#allocation5 + $0x24c] sm:$0xf]  ;;  %v2472_v23 = vor.u32 %v3466_v12, %v2469_v13  ;;  %v3435_v46 = vld [vmem:[#allocation5 + $0x7d0] sm:$0xf]  ;;  %v2860_v13 = vor.u32 %v3567_v7, %v2859_v5 }
  0xb8   : > { %v2725_v16 = vld [vmem:[#allocation5 + $0x268] sm:$0xf0]  ;;  %v3115_v8 = vld [vmem:[#allocation5 + $0x550] sm:$0xf] }
  0xb9   : > { %2008 = vmatpush.bf16.msrb.mxu3 %v3368_v40  ;;  %1983 = vmatpush.bf16.msrb.mxu1 %v2824_v47  ;;  %v3594_v17 = vld [vmem:[#allocation5 + $0x44c] sm:$0xf]  ;;  %v2728_v26 = vor.u32 %v3530_v14, %v2725_v16  ;;  %v3711_v47 = vld [vmem:[#allocation5 + $0x7ec] sm:$0xf0] }
  0xba   : > { %v2981_v18 = vld [vmem:[#allocation5 + $0x468] sm:$0xf0]  ;;  %v3436_v56 = vor.u32 %v3711_v47, %v3435_v46  ;;  %v3495_v16 = vld [vmem:[#allocation5 + $0x12c] sm:$0xf0]  ;;  %v3308_v46 = vor.u32 %v3679_v39, %v3307_v38  ;;  %v2893_v38 = vld [vmem:[#allocation5 + $0x3b0] sm:$0xf0] }
  0xbb   : > { %1996 = vmatpush.bf16.msrb.mxu2 %v3080_v48  ;;  %1971 = vmatpush.bf16.msrb.mxu0 %v2536_v61  ;;  %v3658_v20 = vld [vmem:[#allocation5 + $0x64c] sm:$0xf]  ;;  %v2984_v27 = vor.u32 %v3594_v17, %v2981_v18  ;;  %v3639_v61 = vld [vmem:[#allocation5 + $0x5ac] sm:$0xf0]  ;;  %v3635_v39 = vld [vmem:[#allocation5 + $0x594] sm:$0xf] }
  0xbc   : > { %v3237_v21 = vld [vmem:[#allocation5 + $0x668] sm:$0xf0]  ;;  %v3148_v2 = vor.u32 %v3639_v61, %v3147_v60  ;;  %v2827_v17 = vld [vmem:[#allocation5 + $0x310] sm:$0xf] }
  0xbd   : > { %2009 = vmatpush.bf16.msrb.mxu3 %v3336_v52  ;;  %1984 = vmatpush.bf16.msrb.mxu1 %v2792_v62  ;;  %v3458_v24 = vld [vmem:[#allocation5 + $0xc] sm:$0xf]  ;;  %v3240_v31 = vor.u32 %v3658_v20, %v3237_v21  ;;  %v2635_v52 = vld [vmem:[#allocation5 + $0x190] sm:$0xf] }
  0xbe   : > { %v2437_v25 = vld [vmem:[#allocation5 + $0x28] sm:$0xf0]  ;;  %v3403_v62 = vld [vmem:[#allocation5 + $0x790] sm:$0xf]  ;;  %v2636_v0 = vor.u32 %v3511_v53, %v2635_v52 }
  0xbf   : > { %1997 = vmatpush.bf16.msrb.mxu2 %v3048_v63  ;;  %1972 = vmatpush.bf16.msrb.mxu0 %v2504_v9  ;;  %v3522_v28 = vld [vmem:[#allocation5 + $0x20c] sm:$0xf]  ;;  %v2440_v40 = vor.u32 %v3458_v24, %v2437_v25  ;;  %v3703_v63 = vld [vmem:[#allocation5 + $0x7ac] sm:$0xf0] }
  0xc0   : > { %v2693_v29 = vld [vmem:[#allocation5 + $0x228] sm:$0xf0]  ;;  %v3404_v6 = vor.u32 %v3703_v63, %v3403_v62  ;;  %v3631_v9 = vld [vmem:[#allocation5 + $0x56c] sm:$0xf0] }
  0xc1   : > { %2010 = vmatpush.bf16.msrb.mxu3 %v3304_v3  ;;  %1985 = vmatpush.bf16.msrb.mxu1 %v2760_v10  ;;  %v3586_v30 = vld [vmem:[#allocation5 + $0x40c] sm:$0xf]  ;;  %v2696_v44 = vor.u32 %v3522_v28, %v2693_v29  ;;  %v2603_v3 = vld [vmem:[#allocation5 + $0x150] sm:$0xf]  ;;  %v3116_v14 = vor.u32 %v3631_v9, %v3115_v8 }
  0xc2   : > { %v2949_v32 = vld [vmem:[#allocation5 + $0x428] sm:$0xf0]  ;;  %v3371_v10 = vld [vmem:[#allocation5 + $0x750] sm:$0xf]  ;;  %v2604_v12 = vor.u32 %v3503_v4, %v2603_v3 }
  0xc3   : > { %1998 = vmatpush.bf16.msrb.mxu2 %v3016_v11  ;;  %v3650_v35 = vld [vmem:[#allocation5 + $0x60c] sm:$0xf]  ;;  %1973 = vmatpush.bf16.msrb.mxu0 %v2472_v23  ;;  %v2952_v45 = vor.u32 %v3586_v30, %v2949_v32  ;;  %v3695_v11 = vld [vmem:[#allocation5 + $0x76c] sm:$0xf0] }
  0xc4   : > { %v3205_v36 = vld [vmem:[#allocation5 + $0x628] sm:$0xf0]  ;;  %v3372_v18 = vor.u32 %v3695_v11, %v3371_v10  ;;  %v3559_v20 = vld [vmem:[#allocation5 + $0x32c] sm:$0xf0] }
  0xc5   : > { %2011 = vmatpush.bf16.msrb.mxu3 %v3272_v15  ;;  %1986 = vmatpush.bf16.msrb.mxu1 %v2728_v26  ;;  %v3208_v48 = vor.u32 %v3650_v35, %v3205_v36  ;;  %v2571_v15 = vld [vmem:[#allocation5 + $0x110] sm:$0xf] }
  0xc6   : > { %v3083_v21 = vld [vmem:[#allocation5 + $0x510] sm:$0xf]  ;;  %v2572_v26 = vor.u32 %v3495_v16, %v2571_v15  ;;  %v3515_v15 = vld [vmem:[#allocation5 + $0x1d4] sm:$0xf] }
  0xc7   : > { %1999 = vmatpush.bf16.msrb.mxu2 %v2984_v27  ;;  %1974 = vmatpush.bf16.msrb.mxu0 %v2440_v40  ;;  %v3623_v23 = vld [vmem:[#allocation5 + $0x52c] sm:$0xf0]  ;;  %v2828_v27 = vor.u32 %v3559_v20, %v2827_v17  ;;  %v2669_v16 = vld [vmem:[#allocation5 + $0x1f0] sm:$0xf0] }
  0xc8   : > { %v3339_v24 = vld [vmem:[#allocation5 + $0x710] sm:$0xf]  ;;  %v3084_v28 = vor.u32 %v3623_v23, %v3083_v21  ;;  %v3579_v17 = vld [vmem:[#allocation5 + $0x3d4] sm:$0xf] }
  0xc9   : > { %2012 = vmatpush.bf16.msrb.mxu3 %v3240_v31  ;;  %1987 = vmatpush.bf16.msrb.mxu1 %v2696_v44  ;;  %v3687_v25 = vld [vmem:[#allocation5 + $0x72c] sm:$0xf0]  ;;  %v2925_v20 = vld [vmem:[#allocation5 + $0x3f0] sm:$0xf0] }
  0xca   : > { %1975 = vmatmul.bf16.vlgmr.msrb.gmra.mxu0 %v4027_v33  ;;  %v2539_v29 = vld [vmem:[#allocation5 + $0xd0] sm:$0xf]  ;;  %v3340_v32 = vor.u32 %v3687_v25, %v3339_v24  ;;  %v3643_v21 = vld [vmem:[#allocation5 + $0x5d4] sm:$0xf] }
  0xcb   : > { %2000 = vmatpush.bf16.msrb.mxu2 %v2952_v45  ;;  %2019 = vmatpush.bf16.msra.mxu0 %v2668_v49  ;;  %v3487_v30 = vld [vmem:[#allocation5 + $0xec] sm:$0xf0]  ;;  %v3181_v23 = vld [vmem:[#allocation5 + $0x5f0] sm:$0xf0] }
  0xcc   : > { %1988 = vmatmul.bf16.vlgmr.msrb.gmra.mxu1 %v4029_v34  ;;  %v2795_v31 = vld [vmem:[#allocation5 + $0x2d0] sm:$0xf]  ;;  %v2540_v40 = vor.u32 %v3487_v30, %v2539_v29  ;;  %v2672_v29 = vor.u32 %v3515_v15, %v2669_v16  ;;  %v2928_v30 = vor.u32 %v3579_v17, %v2925_v20  ;;  %v3675_v15 = vld [vmem:[#allocation5 + $0x6d4] sm:$0xf] }
  0xcd   : > { %2013 = vmatpush.bf16.msrb.mxu3 %v3208_v48  ;;  %2032 = vmatpush.bf16.msra.mxu1 %v2924_v50  ;;  %v3551_v35 = vld [vmem:[#allocation5 + $0x2ec] sm:$0xf0]  ;;  %v3309_v16 = vld [vmem:[#allocation5 + $0x6f0] sm:$0xf0] }
  0xce   : > { %2001 = vmatmul.bf16.vlgmr.msrb.gmra.mxu2 %v4022_v19  ;;  %v3051_v36 = vld [vmem:[#allocation5 + $0x4d0] sm:$0xf]  ;;  %v2796_v41 = vor.u32 %v3551_v35, %v2795_v31  ;;  %v3184_v31 = vor.u32 %v3643_v21, %v3181_v23  ;;  %v2637_v35 = vld [vmem:[#allocation5 + $0x1b0] sm:$0xf0] }
  0xcf   : > { %2045 = vmatpush.bf16.msra.mxu2 %v3180_v51  ;;  %2020 = vmatpush.bf16.msra.mxu0 %v2636_v0  ;;  %v3052_v42 = vor.u32 %v3615_v37, %v3051_v36  ;;  %v3479_v44 = vld [vmem:[#allocation5 + $0xac] sm:$0xf0]  ;;  %v3571_v36 = vld [vmem:[#allocation5 + $0x394] sm:$0xf] }
  0xd0   : > { %2014 = vmatmul.bf16.vlgmr.msrb.gmra.mxu3 %v4024_v22  ;;  %v2763_v45 = vld [vmem:[#allocation5 + $0x290] sm:$0xf]  ;;  %v2508_v52 = vor.u32 %v3479_v44, %v2507_v43  ;;  %v2896_v44 = vor.u32 %v3571_v36, %v2893_v38  ;;  %v2509_v23 = vld [vmem:[#allocation5 + $0xb0] sm:$0xf0] }
  0xd1   : > { %2058 = vmatpush.bf16.msra.mxu3 %v3436_v56  ;;  %2033 = vmatpush.bf16.msra.mxu1 %v2892_v1  ;;  %v3543_v47 = vld [vmem:[#allocation5 + $0x2ac] sm:$0xf0]  ;;  %v3467_v38 = vld [vmem:[#allocation5 + $0x54] sm:$0xf] }
  0xd2   : > { %v3019_v48 = vld [vmem:[#allocation5 + $0x490] sm:$0xf]  ;;  %v2764_v53 = vor.u32 %v3543_v47, %v2763_v45  ;;  %v2605_v47 = vld [vmem:[#allocation5 + $0x170] sm:$0xf0] }
  0xd3   : > { %2046 = vmatpush.bf16.msra.mxu2 %v3148_v2  ;;  %2021 = vmatpush.bf16.msra.mxu0 %v2604_v12  ;;  %v3607_v49 = vld [vmem:[#allocation5 + $0x4ac] sm:$0xf0] }
  0xd4   : > { %v3275_v50 = vld [vmem:[#allocation5 + $0x690] sm:$0xf]  ;;  %v3020_v55 = vor.u32 %v3607_v49, %v3019_v48  ;;  %v3563_v48 = vld [vmem:[#allocation5 + $0x354] sm:$0xf] }
  0xd5   : > { %2059 = vmatpush.bf16.msra.mxu3 %v3404_v6  ;;  %2034 = vmatpush.bf16.msra.mxu1 %v2860_v13  ;;  %v3671_v51 = vld [vmem:[#allocation5 + $0x6ac] sm:$0xf0] }
  0xd6   : > { %v2475_v56 = vld [vmem:[#allocation5 + $0x50] sm:$0xf]  ;;  %v3276_v61 = vor.u32 %v3671_v51, %v3275_v50  ;;  %v2861_v50 = vld [vmem:[#allocation5 + $0x370] sm:$0xf0] }
  0xd7   : > { %2047 = vmatpush.bf16.msra.mxu2 %v3116_v14  ;;  %2022 = vmatpush.bf16.msra.mxu0 %v2572_v26  ;;  %v2731_v60 = vld [vmem:[#allocation5 + $0x250] sm:$0xf]  ;;  %v2476_v3 = vor.u32 %v3471_v59, %v2475_v56  ;;  %v3707_v26 = vld [vmem:[#allocation5 + $0x7d4] sm:$0xf]  ;;  %v2864_v59 = vor.u32 %v3563_v48, %v2861_v50 }
  0xd8   : > { %v3535_v62 = vld [vmem:[#allocation5 + $0x26c] sm:$0xf0]  ;;  %v3627_v51 = vld [vmem:[#allocation5 + $0x554] sm:$0xf] }
  0xd9   : > { %2060 = vmatpush.bf16.msra.mxu3 %v3372_v18  ;;  %2035 = vmatpush.bf16.msra.mxu1 %v2828_v27  ;;  %v2987_v63 = vld [vmem:[#allocation5 + $0x450] sm:$0xf]  ;;  %v2732_v6 = vor.u32 %v3535_v62, %v2731_v60  ;;  %v3437_v27 = vld [vmem:[#allocation5 + $0x7f0] sm:$0xf0] }
  0xda   : > { %v3599_v0 = vld [vmem:[#allocation5 + $0x46c] sm:$0xf0]  ;;  %v3440_v37 = vor.u32 %v3707_v26, %v3437_v27  ;;  %v2573_v62 = vld [vmem:[#allocation5 + $0x130] sm:$0xf0]  ;;  %v3312_v26 = vor.u32 %v3675_v15, %v3309_v16  ;;  %v3712_v15 = vld [vmem:[#allocation5 + $0x7f4] sm:$0xf0] }
  0xdb   : > { %2048 = vmatpush.bf16.msra.mxu2 %v3084_v28  ;;  %2023 = vmatpush.bf16.msra.mxu0 %v2540_v40  ;;  %v3243_v1 = vld [vmem:[#allocation5 + $0x650] sm:$0xf]  ;;  %v2988_v7 = vor.u32 %v3599_v0, %v2987_v63  ;;  %v3149_v40 = vld [vmem:[#allocation5 + $0x5b0] sm:$0xf0] }
  0xdc   : > { %v3663_v2 = vld [vmem:[#allocation5 + $0x66c] sm:$0xf0]  ;;  %v3152_v45 = vor.u32 %v3635_v39, %v3149_v40  ;;  %v3555_v63 = vld [vmem:[#allocation5 + $0x314] sm:$0xf] }
  0xdd   : > { %2061 = vmatpush.bf16.msra.mxu3 %v3340_v32  ;;  %2036 = vmatpush.bf16.msra.mxu1 %v2796_v41  ;;  %v2443_v4 = vld [vmem:[#allocation5 + $0x10] sm:$0xf]  ;;  %v3244_v11 = vor.u32 %v3663_v2, %v3243_v1  ;;  %v3507_v32 = vld [vmem:[#allocation5 + $0x194] sm:$0xf] }
  0xde   : > { %v3463_v5 = vld [vmem:[#allocation5 + $0x2c] sm:$0xf0]  ;;  %v3699_v41 = vld [vmem:[#allocation5 + $0x794] sm:$0xf]  ;;  %v2640_v43 = vor.u32 %v3507_v32, %v2637_v35 }
  0xdf   : > { %2049 = vmatpush.bf16.msra.mxu2 %v3052_v42  ;;  %2024 = vmatpush.bf16.msra.mxu0 %v2508_v52  ;;  %v2699_v8 = vld [vmem:[#allocation5 + $0x210] sm:$0xf]  ;;  %v2444_v18 = vor.u32 %v3463_v5, %v2443_v4  ;;  %v3405_v42 = vld [vmem:[#allocation5 + $0x7b0] sm:$0xf0] }
  0xe0   : > { %v3527_v9 = vld [vmem:[#allocation5 + $0x22c] sm:$0xf0]  ;;  %v3408_v49 = vor.u32 %v3699_v41, %v3405_v42  ;;  %v3117_v52 = vld [vmem:[#allocation5 + $0x570] sm:$0xf0] }
  0xe1   : > { %2062 = vmatpush.bf16.msra.mxu3 %v3308_v46  ;;  %2037 = vmatpush.bf16.msra.mxu1 %v2764_v53  ;;  %v2955_v10 = vld [vmem:[#allocation5 + $0x410] sm:$0xf]  ;;  %v2700_v24 = vor.u32 %v3527_v9, %v2699_v8  ;;  %v3499_v46 = vld [vmem:[#allocation5 + $0x154] sm:$0xf]  ;;  %v3120_v60 = vor.u32 %v3627_v51, %v3117_v52 }
  0xe2   : > { %v3591_v12 = vld [vmem:[#allocation5 + $0x42c] sm:$0xf0]  ;;  %v3691_v53 = vld [vmem:[#allocation5 + $0x754] sm:$0xf]  ;;  %v2608_v56 = vor.u32 %v3499_v46, %v2605_v47 }
  0xe3   : > { %2050 = vmatpush.bf16.msra.mxu2 %v3020_v55  ;;  %v3211_v13 = vld [vmem:[#allocation5 + $0x610] sm:$0xf]  ;;  %2025 = vmatpush.bf16.msra.mxu0 %v2476_v3  ;;  %v2956_v25 = vor.u32 %v3591_v12, %v2955_v10  ;;  %v3373_v55 = vld [vmem:[#allocation5 + $0x770] sm:$0xf0] }
  0xe4   : > { %v3655_v14 = vld [vmem:[#allocation5 + $0x62c] sm:$0xf0]  ;;  %v3376_v0 = vor.u32 %v3691_v53, %v3373_v55  ;;  %v2829_v1 = vld [vmem:[#allocation5 + $0x330] sm:$0xf0] }
  0xe5   : > { %2063 = vmatpush.bf16.msra.mxu3 %v3276_v61  ;;  %2038 = vmatpush.bf16.msra.mxu1 %v2732_v6  ;;  %v3212_v28 = vor.u32 %v3655_v14, %v3211_v13  ;;  %v3491_v61 = vld [vmem:[#allocation5 + $0x114] sm:$0xf] }
  0xe6   : > { %v3619_v2 = vld [vmem:[#allocation5 + $0x514] sm:$0xf]  ;;  %v2576_v5 = vor.u32 %v3491_v61, %v2573_v62 }
  0xe7   : > { %2051 = vmatpush.bf16.msra.mxu2 %v2988_v7  ;;  %2026 = vmatpush.bf16.msra.mxu0 %v2444_v18  ;;  %v3085_v3 = vld [vmem:[#allocation5 + $0x530] sm:$0xf0]  ;;  %v1820_v35 = vpop.f32.mrf.mxu0 }
  0xe8   : > { %v3683_v4 = vld [vmem:[#allocation5 + $0x714] sm:$0xf]  ;;  %v3088_v7 = vor.u32 %v3619_v2, %v3085_v3 }
  0xe9   : > { %2064 = vmatpush.bf16.msra.mxu3 %v3244_v11  ;;  %2039 = vmatpush.bf16.msra.mxu1 %v2700_v24  ;;  %v3483_v6 = vld [vmem:[#allocation5 + $0xd4] sm:$0xf] }
  0xea   : > { %2027 = vmatmul.bf16.vlgmr.msra.gmra.mxu0 %v4027_v33  ;;  %v3341_v33 = vld [vmem:[#allocation5 + $0x730] sm:$0xf0] }
  0xeb   : > { %2052 = vmatpush.bf16.msra.mxu2 %v2956_v25  ;;  %2071 = vmatpush.bf16.msrb.mxu0 %v2672_v29  ;;  %v2541_v8 = vld [vmem:[#allocation5 + $0xf0] sm:$0xf0]  ;;  %v3344_v11 = vor.u32 %v3683_v4, %v3341_v33  ;;  %v1833_v42 = vpop.f32.mrf.mxu1  ;;  %v2675_v4 = vld [vmem:[#allocation5 + $0x1d8] sm:$0xf] }
  0xec   : > { %2040 = vmatmul.bf16.vlgmr.msra.gmra.mxu1 %v4029_v34  ;;  %v2832_v34 = vor.u32 %v3555_v63, %v2829_v1  ;;  %v3547_v9 = vld [vmem:[#allocation5 + $0x2d4] sm:$0xf]  ;;  %v2544_v17 = vor.u32 %v3483_v6, %v2541_v8  ;;  %v3520_v33 = vld [vmem:[#allocation5 + $0x1f4] sm:$0xf0] }
  0xed   : > { %2065 = vmatpush.bf16.msra.mxu3 %v3212_v28  ;;  %2084 = vmatpush.bf16.msrb.mxu1 %v2928_v30  ;;  %v2797_v10 = vld [vmem:[#allocation5 + $0x2f0] sm:$0xf0]  ;;  %v3187_v8 = vld [vmem:[#allocation5 + $0x5d8] sm:$0xf] }
  0xee   : > { %2053 = vmatmul.bf16.vlgmr.msra.gmra.mxu2 %v4022_v19  ;;  %v3611_v12 = vld [vmem:[#allocation5 + $0x4d4] sm:$0xf]  ;;  %v2800_v20 = vor.u32 %v3547_v9, %v2797_v10  ;;  %v3648_v9 = vld [vmem:[#allocation5 + $0x5f4] sm:$0xf0] }
  0xef   : > { %2097 = vmatpush.bf16.msrb.mxu2 %v3184_v31  ;;  %2072 = vmatpush.bf16.msrb.mxu0 %v2640_v43  ;;  %v3053_v13 = vld [vmem:[#allocation5 + $0x4f0] sm:$0xf0]  ;;  %v1822_v10 = vpop.f32.mrf.mxu0 }
  0xf0   : > { %2066 = vmatmul.bf16.vlgmr.msra.gmra.mxu3 %v4024_v22  ;;  %v4053_v14 = vld [vmem:[%s4160_s4] sm:$0xff]  ;;  %v3056_v21 = vor.u32 %v3611_v12, %v3053_v13 }
  0xf1   : > { %2110 = vmatpush.bf16.msrb.mxu3 %v3440_v37  ;;  %2085 = vmatpush.bf16.msrb.mxu1 %v2896_v44  ;;  %v3475_v18 = vld [vmem:[#allocation5 + $0x94] sm:$0xf]  ;;  %v1795_v25 = vperm.slane %v4053_v14, 0  ;;  %v1846_v50 = vpop.f32.mrf.mxu2  ;;  %v3443_v13 = vld [vmem:[#allocation5 + $0x7d8] sm:$0xf] }
  0xf2   : > { %v3539_v24 = vld [vmem:[#allocation5 + $0x294] sm:$0xf]  ;;  %v2512_v32 = vor.u32 %v3475_v18, %v2509_v23  ;;  %v2676_v18 = vor.u32 %v3520_v33, %v2675_v4  ;;  %v2643_v23 = vld [vmem:[#allocation5 + $0x198] sm:$0xf] }
  0xf3   : > { %2098 = vmatpush.bf16.msrb.mxu2 %v3152_v45  ;;  %2073 = vmatpush.bf16.msrb.mxu0 %v2608_v56  ;;  %v2765_v27 = vld [vmem:[#allocation5 + $0x2b0] sm:$0xf0]  ;;  %v1821_v41 = vadd.f32 %v1820_v35, %v1795_v25  ;;  %v1859_v3 = vpop.f32.mrf.mxu3  ;;  %v1835_v16 = vpop.f32.mrf.mxu1  ;;  %v2899_v25 = vld [vmem:[#allocation5 + $0x398] sm:$0xf] }
  0xf4   : > { %v3603_v28 = vld [vmem:[#allocation5 + $0x494] sm:$0xf]  ;;  %v2768_v36 = vor.u32 %v3539_v24, %v2765_v27  ;;  %v3512_v24 = vld [vmem:[#allocation5 + $0x1b4] sm:$0xf0]  ;;  %v3444_v27 = vor.u32 %v3712_v15, %v3443_v13 }
  0xf5   : > { %2111 = vmatpush.bf16.msrb.mxu3 %v3408_v49  ;;  %2086 = vmatpush.bf16.msrb.mxu1 %v2864_v59  ;;  %v3021_v29 = vld [vmem:[#allocation5 + $0x4b0] sm:$0xf0]  ;;  %v1834_v49 = vadd.f32 %v1833_v42, %v1821_v41  ;;  %v2644_v35 = vor.u32 %v3512_v24, %v2643_v23  ;;  %v2867_v41 = vld [vmem:[#allocation5 + $0x358] sm:$0xf] }
  0xf6   : > { %v3667_v30 = vld [vmem:[#allocation5 + $0x694] sm:$0xf]  ;;  %v3024_v37 = vor.u32 %v3603_v28, %v3021_v29  ;;  %v3576_v28 = vld [vmem:[#allocation5 + $0x3b4] sm:$0xf0] }
  0xf7   : > { %2099 = vmatpush.bf16.msrb.mxu2 %v3120_v60  ;;  %2074 = vmatpush.bf16.msrb.mxu0 %v2576_v5  ;;  %v3277_v31 = vld [vmem:[#allocation5 + $0x6b0] sm:$0xf0]  ;;  %v1847_v62 = vadd.f32 %v1846_v50, %v1834_v49  ;;  %v2931_v5 = vld [vmem:[#allocation5 + $0x3d8] sm:$0xf] }
  0xf8   : > { %v2477_v39 = vld [vmem:[#allocation5 + $0x70] sm:$0xf0]  ;;  %v3280_v43 = vor.u32 %v3667_v30, %v3277_v31  ;;  %v3155_v29 = vld [vmem:[#allocation5 + $0x598] sm:$0xf] }
  0xf9   : > { %2112 = vmatpush.bf16.msrb.mxu3 %v3376_v0  ;;  %2087 = vmatpush.bf16.msrb.mxu1 %v2832_v34  ;;  %v3531_v40 = vld [vmem:[#allocation5 + $0x254] sm:$0xf]  ;;  %v2480_v51 = vor.u32 %v3467_v38, %v2477_v39  ;;  %v4056_v6 = vadd.f32 %v1859_v3, %v1847_v62  ;;  %v3640_v30 = vld [vmem:[#allocation5 + $0x5b4] sm:$0xf0] }
  0xfa   : > { %v2733_v44 = vld [vmem:[#allocation5 + $0x270] sm:$0xf0]  ;;  %v3411_v31 = vld [vmem:[#allocation5 + $0x798] sm:$0xf]  ;;  %v3156_v38 = vor.u32 %v3640_v30, %v3155_v29 }
  0xfb   : > { %2100 = vmatpush.bf16.msrb.mxu2 %v3088_v7  ;;  %2075 = vmatpush.bf16.msrb.mxu0 %v2544_v17  ;;  %v3595_v45 = vld [vmem:[#allocation5 + $0x454] sm:$0xf]  ;;  %v2736_v55 = vor.u32 %v3531_v40, %v2733_v44  ;;  %v3584_v7 = vld [vmem:[#allocation5 + $0x3f4] sm:$0xf0] }
  0xfc   : > { %v2989_v46 = vld [vmem:[#allocation5 + $0x470] sm:$0xf0]  ;;  %v2611_v39 = vld [vmem:[#allocation5 + $0x158] sm:$0xf] }
  0xfd   : > { %2113 = vmatpush.bf16.msrb.mxu3 %v3344_v11  ;;  %2088 = vmatpush.bf16.msrb.mxu1 %v2800_v20  ;;  %v3659_v47 = vld [vmem:[#allocation5 + $0x654] sm:$0xf]  ;;  %v2992_v56 = vor.u32 %v3595_v45, %v2989_v46  ;;  %v2932_v20 = vor.u32 %v3584_v7, %v2931_v5  ;;  %v3504_v40 = vld [vmem:[#allocation5 + $0x174] sm:$0xf0] }
  0xfe   : > { %v3245_v48 = vld [vmem:[#allocation5 + $0x670] sm:$0xf0]  ;;  %v3123_v44 = vld [vmem:[#allocation5 + $0x558] sm:$0xf]  ;;  %v2612_v49 = vor.u32 %v3504_v40, %v2611_v39 }
  0xff   : > { %2101 = vmatpush.bf16.msrb.mxu2 %v3056_v21  ;;  %2076 = vmatpush.bf16.msrb.mxu0 %v2512_v32  ;;  %v3459_v52 = vld [vmem:[#allocation5 + $0x14] sm:$0xf]  ;;  %v3248_v63 = vor.u32 %v3659_v47, %v3245_v48  ;;  %v3188_v21 = vor.u32 %v3648_v9, %v3187_v8  ;;  %v3704_v32 = vld [vmem:[#allocation5 + $0x7b4] sm:$0xf0] }
 0x100   : > { %v2445_v53 = vld [vmem:[#allocation5 + $0x30] sm:$0xf0]  ;;  %v3412_v42 = vor.u32 %v3704_v32, %v3411_v31  ;;  %v3632_v45 = vld [vmem:[#allocation5 + $0x574] sm:$0xf0] }
 0x101   : > { %2114 = vmatpush.bf16.msrb.mxu3 %v3312_v26  ;;  %2089 = vmatpush.bf16.msrb.mxu1 %v2768_v36  ;;  %v3523_v59 = vld [vmem:[#allocation5 + $0x214] sm:$0xf]  ;;  %v2448_v34 = vor.u32 %v3459_v52, %v2445_v53  ;;  %v1848_v26 = vpop.f32.mrf.mxu2  ;;  %v1861_v36 = vpop.f32.mrf.mxu3  ;;  %v3379_v46 = vld [vmem:[#allocation5 + $0x758] sm:$0xf]  ;;  %v3124_v53 = vor.u32 %v3632_v45, %v3123_v44 }
 0x102   : > { %v2701_v60 = vld [vmem:[#allocation5 + $0x230] sm:$0xf0]  ;;  %v3696_v47 = vld [vmem:[#allocation5 + $0x774] sm:$0xf0] }
 0x103   : > { %2102 = vmatpush.bf16.msrb.mxu2 %v3024_v37  ;;  %v3587_v61 = vld [vmem:[#allocation5 + $0x414] sm:$0xf]  ;;  %2077 = vmatpush.bf16.msrb.mxu0 %v2480_v51  ;;  %v2704_v11 = vor.u32 %v3523_v59, %v2701_v60  ;;  %v2900_v37 = vor.u32 %v3576_v28, %v2899_v25  ;;  %v2579_v50 = vld [vmem:[#allocation5 + $0x118] sm:$0xf]  ;;  %v4063_v51 = vld [vmem:[#allocation1 + $0x9] sm:$0xff]  ;;  %v1796_v59 = vperm.slane %v4053_v14, 1  ;;  %v3380_v60 = vor.u32 %v3696_v47, %v3379_v46 }
 0x104   : > { %v2957_v0 = vld [vmem:[#allocation5 + $0x430] sm:$0xf0]  ;;  %v3091_v62 = vld [vmem:[#allocation5 + $0x518] sm:$0xf] }
 0x105   : > { %2115 = vmatpush.bf16.msrb.mxu3 %v3280_v43  ;;  %v3651_v1 = vld [vmem:[#allocation5 + $0x614] sm:$0xf]  ;;  %2090 = vmatpush.bf16.msrb.mxu1 %v2736_v55  ;;  %v2960_v12 = vor.u32 %v3587_v61, %v2957_v0  ;;  %v3568_v43 = vld [vmem:[#allocation5 + $0x374] sm:$0xf0] }
 0x106   : > { %v3213_v2 = vld [vmem:[#allocation5 + $0x630] sm:$0xf0]  ;;  %v2868_v52 = vor.u32 %v3568_v43, %v2867_v41  ;;  %v3496_v55 = vld [vmem:[#allocation5 + $0x134] sm:$0xf0] }
 0x107   : > { %2103 = vmatpush.bf16.msrb.mxu2 %v2992_v56  ;;  %v3216_v17 = vor.u32 %v3651_v1, %v3213_v2  ;;  %2078 = vmatpush.bf16.msrb.mxu0 %v2448_v34  ;;  %v4059_v48 = vld [vmem:[#allocation1] sm:$0xff]  ;;  %v2580_v2 = vor.u32 %v3496_v55, %v2579_v50  ;;  %v1872_v3 = vpop.f32.mrf.mxu0 }
 0x108   : > { %v2835_v56 = vld [vmem:[#allocation5 + $0x318] sm:$0xf]  ;;  %v1873_v8 = vadd.f32 %v1872_v3, %v1796_v59 }
 0x109   : > { %2116 = vmatpush.bf16.msrb.mxu3 %v3248_v63  ;;  %2091 = vmatpush.bf16.msrb.mxu1 %v2704_v11  ;;  %v3560_v61 = vld [vmem:[#allocation5 + $0x334] sm:$0xf0]  ;;  %v1885_v9 = vpop.f32.mrf.mxu1 }
 0x10a   : > { %2079 = vmatmul.bf16.vlgmr.msrb.gmra.mxu0 %v4059_v48  ;;  %v3624_v63 = vld [vmem:[#allocation5 + $0x534] sm:$0xf0]  ;;  %v2836_v4 = vor.u32 %v3560_v61, %v2835_v56 }
 0x10b   : > { %2104 = vmatpush.bf16.msrb.mxu2 %v2960_v12  ;;  %2123 = vmatpush.bf16.msra.mxu0 %v2676_v18  ;;  %v3347_v0 = vld [vmem:[#allocation5 + $0x718] sm:$0xf]  ;;  %v3092_v33 = vor.u32 %v3624_v63, %v3091_v62 }
 0x10c   : > { %2092 = vmatmul.bf16.vlgmr.msrb.gmra.mxu1 %v4063_v51  ;;  %v3688_v1 = vld [vmem:[#allocation5 + $0x734] sm:$0xf0] }
 0x10d   : > { %2117 = vmatpush.bf16.msrb.mxu3 %v3216_v17  ;;  %2136 = vmatpush.bf16.msra.mxu1 %v2932_v20  ;;  %v2547_v5 = vld [vmem:[#allocation5 + $0xd8] sm:$0xf]  ;;  %v3348_v10 = vor.u32 %v3688_v1, %v3347_v0  ;;  %v1886_v17 = vadd.f32 %v1885_v9, %v1873_v8  ;;  %v3580_v8 = vld [vmem:[#allocation5 + $0x3dc] sm:$0xf] }
 0x10e   : > { %2105 = vmatmul.bf16.vlgmr.msrb.gmra.mxu2 %v4022_v19  ;;  %v3488_v34 = vld [vmem:[#allocation5 + $0xf4] sm:$0xf0] }
 0x10f   : > { %2149 = vmatpush.bf16.msra.mxu2 %v3188_v21  ;;  %2124 = vmatpush.bf16.msra.mxu0 %v2644_v35  ;;  %v2803_v7 = vld [vmem:[#allocation5 + $0x2d8] sm:$0xf]  ;;  %v2548_v18 = vor.u32 %v3488_v34, %v2547_v5  ;;  %v1874_v39 = vpop.f32.mrf.mxu0  ;;  %v3516_v34 = vld [vmem:[#allocation5 + $0x1dc] sm:$0xf] }
 0x110   : > { %2118 = vmatmul.bf16.vlgmr.msrb.gmra.mxu3 %v4024_v22  ;;  %v3552_v11 = vld [vmem:[#allocation5 + $0x2f4] sm:$0xf0]  ;;  %v3500_v39 = vld [vmem:[#allocation5 + $0x15c] sm:$0xf] }
 0x111   : > { %2162 = vmatpush.bf16.msra.mxu3 %v3444_v27  ;;  %2137 = vmatpush.bf16.msra.mxu1 %v2900_v37  ;;  %v3059_v12 = vld [vmem:[#allocation5 + $0x4d8] sm:$0xf]  ;;  %v2804_v20 = vor.u32 %v3552_v11, %v2803_v7  ;;  %v1898_v26 = vpop.f32.mrf.mxu2  ;;  %v1887_v45 = vpop.f32.mrf.mxu1  ;;  %v2677_v7 = vld [vmem:[#allocation5 + $0x1f8] sm:$0xf0] }
 0x112   : > { %v3616_v13 = vld [vmem:[#allocation5 + $0x4f4] sm:$0xf0]  ;;  %v1899_v31 = vadd.f32 %v1898_v26, %v1886_v17  ;;  %v3644_v11 = vld [vmem:[#allocation5 + $0x5dc] sm:$0xf] }
 0x113   : > { %2150 = vmatpush.bf16.msra.mxu2 %v3156_v38  ;;  %2125 = vmatpush.bf16.msra.mxu0 %v2612_v49  ;;  %v3315_v15 = vld [vmem:[#allocation5 + $0x6d8] sm:$0xf]  ;;  %v3060_v21 = vor.u32 %v3616_v13, %v3059_v12  ;;  %v1911_v32 = vpop.f32.mrf.mxu3  ;;  %v3189_v12 = vld [vmem:[#allocation5 + $0x5f8] sm:$0xf0] }
 0x114   : > { %v3680_v16 = vld [vmem:[#allocation5 + $0x6f4] sm:$0xf0]  ;;  %v4067_v38 = vadd.f32 %v1911_v32, %v1899_v31  ;;  %v3445_v17 = vld [vmem:[#allocation5 + $0x7f8] sm:$0xf0] }
 0x115   : > { %2163 = vmatpush.bf16.msra.mxu3 %v3412_v42  ;;  %2138 = vmatpush.bf16.msra.mxu1 %v2868_v52  ;;  %v2515_v23 = vld [vmem:[#allocation5 + $0x98] sm:$0xf]  ;;  %v3316_v27 = vor.u32 %v3680_v16, %v3315_v15  ;;  %v3708_v16 = vld [vmem:[#allocation5 + $0x7dc] sm:$0xf] }
 0x116   : > { %v3480_v24 = vld [vmem:[#allocation5 + $0xb4] sm:$0xf0]  ;;  %v3572_v26 = vld [vmem:[#allocation5 + $0x39c] sm:$0xf] }
 0x117   : > { %2151 = vmatpush.bf16.msra.mxu2 %v3124_v53  ;;  %2126 = vmatpush.bf16.msra.mxu0 %v2580_v2  ;;  %v2771_v25 = vld [vmem:[#allocation5 + $0x298] sm:$0xf]  ;;  %v2516_v37 = vor.u32 %v3480_v24, %v2515_v23  ;;  %v3192_v23 = vor.u32 %v3644_v11, %v3189_v12  ;;  %v3508_v24 = vld [vmem:[#allocation5 + $0x19c] sm:$0xf] }
 0x118   : > { %v3544_v28 = vld [vmem:[#allocation5 + $0x2b4] sm:$0xf0]  ;;  %v3700_v31 = vld [vmem:[#allocation5 + $0x79c] sm:$0xf] }
 0x119   : > { %2164 = vmatpush.bf16.msra.mxu3 %v3380_v60  ;;  %2139 = vmatpush.bf16.msra.mxu1 %v2836_v4  ;;  %v3027_v29 = vld [vmem:[#allocation5 + $0x498] sm:$0xf]  ;;  %v2772_v40 = vor.u32 %v3544_v28, %v2771_v25  ;;  %v1900_v1 = vpop.f32.mrf.mxu2  ;;  %v2645_v25 = vld [vmem:[#allocation5 + $0x1b8] sm:$0xf0] }
 0x11a   : > { %v3608_v30 = vld [vmem:[#allocation5 + $0x4b4] sm:$0xf0]  ;;  %v2901_v28 = vld [vmem:[#allocation5 + $0x3b8] sm:$0xf0] }
 0x11b   : > { %2152 = vmatpush.bf16.msra.mxu2 %v3092_v33  ;;  %v3283_v35 = vld [vmem:[#allocation5 + $0x698] sm:$0xf]  ;;  %2127 = vmatpush.bf16.msra.mxu0 %v2548_v18  ;;  %v3028_v41 = vor.u32 %v3608_v30, %v3027_v29  ;;  %v1913_v5 = vpop.f32.mrf.mxu3  ;;  %v3636_v29 = vld [vmem:[#allocation5 + $0x59c] sm:$0xf] }
 0x11c   : > { %v3672_v36 = vld [vmem:[#allocation5 + $0x6b4] sm:$0xf0]  ;;  %v3157_v30 = vld [vmem:[#allocation5 + $0x5b8] sm:$0xf0] }
 0x11d   : > { %2165 = vmatpush.bf16.msra.mxu3 %v3348_v10  ;;  %2140 = vmatpush.bf16.msra.mxu1 %v2804_v20  ;;  %v2483_v42 = vld [vmem:[#allocation5 + $0x58] sm:$0xf]  ;;  %v3284_v46 = vor.u32 %v3672_v36, %v3283_v35  ;;  %v2933_v10 = vld [vmem:[#allocation5 + $0x3f8] sm:$0xf0]  ;;  %v2680_v20 = vor.u32 %v3516_v34, %v2677_v7  ;;  %v2648_v35 = vor.u32 %v3508_v24, %v2645_v25 }
 0x11e   : > { %v3472_v43 = vld [vmem:[#allocation5 + $0x74] sm:$0xf0]  ;;  %v3413_v32 = vld [vmem:[#allocation5 + $0x7b8] sm:$0xf0]  ;;  %v2904_v36 = vor.u32 %v3572_v26, %v2901_v28 }
 0x11f   : > { %2153 = vmatpush.bf16.msra.mxu2 %v3060_v21  ;;  %v2739_v44 = vld [vmem:[#allocation5 + $0x258] sm:$0xf]  ;;  %2128 = vmatpush.bf16.msra.mxu0 %v2516_v37  ;;  %v2484_v55 = vor.u32 %v3472_v43, %v2483_v42  ;;  %v2936_v21 = vor.u32 %v3580_v8, %v2933_v10  ;;  %v3160_v37 = vor.u32 %v3636_v29, %v3157_v30  ;;  %v2869_v43 = vld [vmem:[#allocation5 + $0x378] sm:$0xf0] }
 0x120   : > { %v3536_v47 = vld [vmem:[#allocation5 + $0x274] sm:$0xf0]  ;;  %v3416_v42 = vor.u32 %v3700_v31, %v3413_v32  ;;  %v3125_v45 = vld [vmem:[#allocation5 + $0x578] sm:$0xf0] }
 0x121   : > { %2166 = vmatpush.bf16.msra.mxu3 %v3316_v27  ;;  %v2995_v49 = vld [vmem:[#allocation5 + $0x458] sm:$0xf]  ;;  %2141 = vmatpush.bf16.msra.mxu1 %v2772_v40  ;;  %v2740_v60 = vor.u32 %v3536_v47, %v2739_v44  ;;  %v3448_v27 = vor.u32 %v3708_v16, %v3445_v17  ;;  %v2613_v40 = vld [vmem:[#allocation5 + $0x178] sm:$0xf0] }
 0x122   : > { %v3600_v50 = vld [vmem:[#allocation5 + $0x474] sm:$0xf0]  ;;  %v3628_v44 = vld [vmem:[#allocation5 + $0x55c] sm:$0xf] }
 0x123   : > { %v3251_v52 = vld [vmem:[#allocation5 + $0x658] sm:$0xf]  ;;  %2154 = vmatpush.bf16.msra.mxu2 %v3028_v41  ;;  %v2996_v61 = vor.u32 %v3600_v50, %v2995_v49  ;;  %2129 = vmatpush.bf16.msra.mxu0 %v2484_v55  ;;  %v3564_v41 = vld [vmem:[#allocation5 + $0x35c] sm:$0xf]  ;;  %v2616_v49 = vor.u32 %v3500_v39, %v2613_v40 }
 0x124   : > { %v3664_v53 = vld [vmem:[#allocation5 + $0x674] sm:$0xf0]  ;;  %v3381_v47 = vld [vmem:[#allocation5 + $0x778] sm:$0xf0] }
 0x125   : > { %v2451_v56 = vld [vmem:[#allocation5 + $0x18] sm:$0xf]  ;;  %2167 = vmatpush.bf16.msra.mxu3 %v3284_v46  ;;  %v3252_v2 = vor.u32 %v3664_v53, %v3251_v52  ;;  %2142 = vmatpush.bf16.msra.mxu1 %v2740_v60  ;;  %v3692_v46 = vld [vmem:[#allocation5 + $0x75c] sm:$0xf]  ;;  %v2872_v52 = vor.u32 %v3564_v41, %v2869_v43  ;;  %v3128_v53 = vor.u32 %v3628_v44, %v3125_v45 }
 0x126   : > { %v3464_v59 = vld [vmem:[#allocation5 + $0x34] sm:$0xf0]  ;;  %v3492_v50 = vld [vmem:[#allocation5 + $0x11c] sm:$0xf]  ;;  %v3384_v60 = vor.u32 %v3692_v46, %v3381_v47 }
 0x127   : > { %v2707_v62 = vld [vmem:[#allocation5 + $0x218] sm:$0xf]  ;;  %v2452_v9 = vor.u32 %v3464_v59, %v2451_v56  ;;  %2155 = vmatpush.bf16.msra.mxu2 %v2996_v61  ;;  %v2581_v55 = vld [vmem:[#allocation5 + $0x138] sm:$0xf0]  ;;  %v1797_v59 = vperm.slane %v4053_v14, 2 }
 0x128   : > { %v3528_v63 = vld [vmem:[#allocation5 + $0x234] sm:$0xf0]  ;;  %v3556_v56 = vld [vmem:[#allocation5 + $0x31c] sm:$0xf] }
 0x129   : > { %v2963_v0 = vld [vmem:[#allocation5 + $0x418] sm:$0xf]  ;;  %v2708_v13 = vor.u32 %v3528_v63, %v2707_v62  ;;  %2168 = vmatpush.bf16.msra.mxu3 %v3252_v2  ;;  %2130 = vmatpush.bf16.msra.mxu0 %v2452_v9  ;;  %v2837_v61 = vld [vmem:[#allocation5 + $0x338] sm:$0xf0]  ;;  %v2584_v2 = vor.u32 %v3492_v50, %v2581_v55  ;;  %v1937_v9 = vpop.f32.mrf.mxu1 }
 0x12a   : > { %v3592_v3 = vld [vmem:[#allocation5 + $0x434] sm:$0xf0]  ;;  %v3620_v62 = vld [vmem:[#allocation5 + $0x51c] sm:$0xf] }
 0x12b   : > { %v3219_v4 = vld [vmem:[#allocation5 + $0x618] sm:$0xf]  ;;  %v2964_v15 = vor.u32 %v3592_v3, %v2963_v0  ;;  %2143 = vmatpush.bf16.msra.mxu1 %v2708_v13  ;;  %v3093_v63 = vld [vmem:[#allocation5 + $0x538] sm:$0xf0]  ;;  %v1924_v3 = vpop.f32.mrf.mxu0 }
 0x12c   : > { %v3656_v33 = vld [vmem:[#allocation5 + $0x634] sm:$0xf0]  ;;  %2131 = vmatmul.bf16.vlgmr.msra.gmra.mxu0 %v4059_v48  ;;  %v3684_v0 = vld [vmem:[#allocation5 + $0x71c] sm:$0xf]  ;;  %v1925_v8 = vadd.f32 %v1924_v3, %v1797_v59 }
 0x12d   : > { %v3220_v18 = vor.u32 %v3656_v33, %v3219_v4  ;;  %2156 = vmatpush.bf16.msra.mxu2 %v2964_v15  ;;  %2175 = vmatpush.bf16.msrb.mxu0 %v2680_v20  ;;  %v3349_v1 = vld [vmem:[#allocation5 + $0x738] sm:$0xf0]  ;;  %v2840_v4 = vor.u32 %v3556_v56, %v2837_v61  ;;  %v3096_v33 = vor.u32 %v3620_v62, %v3093_v63 }
 0x12e   : > { %2144 = vmatmul.bf16.vlgmr.msra.gmra.mxu1 %v4063_v51  ;;  %v3484_v5 = vld [vmem:[#allocation5 + $0xdc] sm:$0xf]  ;;  %v3352_v10 = vor.u32 %v3684_v0, %v3349_v1  ;;  %v1938_v17 = vadd.f32 %v1937_v9, %v1925_v8 }
 0x12f   : > { %2169 = vmatpush.bf16.msra.mxu3 %v3220_v18  ;;  %2188 = vmatpush.bf16.msrb.mxu1 %v2936_v21  ;;  %v2549_v34 = vld [vmem:[#allocation5 + $0xf8] sm:$0xf0] }
 0x130   : > { %2157 = vmatmul.bf16.vlgmr.msra.gmra.mxu2 %v4022_v19  ;;  %v3548_v7 = vld [vmem:[#allocation5 + $0x2dc] sm:$0xf]  ;;  %v2552_v18 = vor.u32 %v3484_v5, %v2549_v34 }
 0x131   : > { %2201 = vmatpush.bf16.msrb.mxu2 %v3192_v23  ;;  %2176 = vmatpush.bf16.msrb.mxu0 %v2648_v35  ;;  %v2805_v11 = vld [vmem:[#allocation5 + $0x2f8] sm:$0xf0]  ;;  %v1950_v26 = vpop.f32.mrf.mxu2  ;;  %v1939_v46 = vpop.f32.mrf.mxu1 }
 0x132   : > { %2170 = vmatmul.bf16.vlgmr.msra.gmra.mxu3 %v4024_v22  ;;  %v3612_v12 = vld [vmem:[#allocation5 + $0x4dc] sm:$0xf]  ;;  %v2808_v20 = vor.u32 %v3548_v7, %v2805_v11  ;;  %v1951_v31 = vadd.f32 %v1950_v26, %v1938_v17  ;;  %v1798_v11 = vperm.slane %v4053_v14, 3 }
 0x133   : > { %2214 = vmatpush.bf16.msrb.mxu3 %v3448_v27  ;;  %2189 = vmatpush.bf16.msrb.mxu1 %v2904_v36  ;;  %v3061_v13 = vld [vmem:[#allocation5 + $0x4f8] sm:$0xf0]  ;;  %v1963_v32 = vpop.f32.mrf.mxu3  ;;  %v1926_v40 = vpop.f32.mrf.mxu0 }
 0x134   : > { %v3676_v15 = vld [vmem:[#allocation5 + $0x6dc] sm:$0xf]  ;;  %v3064_v21 = vor.u32 %v3612_v12, %v3061_v13  ;;  %v4074_v39 = vadd.f32 %v1963_v32, %v1951_v31  ;;  %v3449_v40 = vmul.f32 -1.442695, %v4056_v6 }
 0x135   : > { %2202 = vmatpush.bf16.msrb.mxu2 %v3160_v37  ;;  %2177 = vmatpush.bf16.msrb.mxu0 %v2616_v49  ;;  %v3317_v16 = vld [vmem:[#allocation5 + $0x6f8] sm:$0xf0] }
 0x136   : > { %v3476_v23 = vld [vmem:[#allocation5 + $0x9c] sm:$0xf]  ;;  %v3320_v27 = vor.u32 %v3676_v15, %v3317_v16  ;;  %3766 = vpow2.f32 %v3449_v40 }
 0x137   : > { %2215 = vmatpush.bf16.msrb.mxu3 %v3416_v42  ;;  %2190 = vmatpush.bf16.msrb.mxu1 %v2872_v52  ;;  %v2517_v24 = vld [vmem:[#allocation5 + $0xb8] sm:$0xf0] }
 0x138   : > { %v3540_v25 = vld [vmem:[#allocation5 + $0x29c] sm:$0xf]  ;;  %v2520_v37 = vor.u32 %v3476_v23, %v2517_v24 }
 0x139   : > { %2203 = vmatpush.bf16.msrb.mxu2 %v3128_v53  ;;  %2178 = vmatpush.bf16.msrb.mxu0 %v2584_v2  ;;  %v2773_v28 = vld [vmem:[#allocation5 + $0x2b8] sm:$0xf0]  ;;  %v1952_v0 = vpop.f32.mrf.mxu2 }
 0x13a   : > { %v3604_v29 = vld [vmem:[#allocation5 + $0x49c] sm:$0xf]  ;;  %v2776_v41 = vor.u32 %v3540_v25, %v2773_v28 }
 0x13b   : > { %2216 = vmatpush.bf16.msrb.mxu3 %v3384_v60  ;;  %2191 = vmatpush.bf16.msrb.mxu1 %v2840_v4  ;;  %v3029_v30 = vld [vmem:[#allocation5 + $0x4b8] sm:$0xf0] }
 0x13c   : > { %v3668_v35 = vld [vmem:[#allocation5 + $0x69c] sm:$0xf]  ;;  %v3032_v42 = vor.u32 %v3604_v29, %v3029_v30 }
 0x13d   : > { %2204 = vmatpush.bf16.msrb.mxu2 %v3096_v33  ;;  %v3285_v36 = vld [vmem:[#allocation5 + $0x6b8] sm:$0xf0]  ;;  %2179 = vmatpush.bf16.msrb.mxu0 %v2552_v18  ;;  %v1965_v33 = vpop.f32.mrf.mxu3 }
 0x13e   : > { %v3468_v43 = vld [vmem:[#allocation5 + $0x5c] sm:$0xf]  ;;  %v3288_v47 = vor.u32 %v3668_v35, %v3285_v36 }
 0x13f   : > { %2217 = vmatpush.bf16.msrb.mxu3 %v3352_v10  ;;  %2192 = vmatpush.bf16.msrb.mxu1 %v2808_v20  ;;  %v2485_v44 = vld [vmem:[#allocation5 + $0x78] sm:$0xf0] }
 0x140   : > { %v3532_v45 = vld [vmem:[#allocation5 + $0x25c] sm:$0xf]  ;;  %v2488_v56 = vor.u32 %v3468_v43, %v2485_v44  ;;  %v3767_v44 = vpop.eup %3766 }
 0x141   : > { %2205 = vmatpush.bf16.msrb.mxu2 %v3064_v21  ;;  %v2741_v49 = vld [vmem:[#allocation5 + $0x278] sm:$0xf0]  ;;  %2180 = vmatpush.bf16.msrb.mxu0 %v2520_v37 }
 0x142   : > { %v3596_v50 = vld [vmem:[#allocation5 + $0x45c] sm:$0xf]  ;;  %v2744_v59 = vor.u32 %v3532_v45, %v2741_v49 }
 0x143   : > { %2218 = vmatpush.bf16.msrb.mxu3 %v3320_v27  ;;  %v2997_v52 = vld [vmem:[#allocation5 + $0x478] sm:$0xf0]  ;;  %2193 = vmatpush.bf16.msrb.mxu1 %v2776_v41 }
 0x144   : > { %v3660_v53 = vld [vmem:[#allocation5 + $0x65c] sm:$0xf]  ;;  %v3000_v60 = vor.u32 %v3596_v50, %v2997_v52 }
 0x145   : > { %v3253_v55 = vld [vmem:[#allocation5 + $0x678] sm:$0xf0]  ;;  %2206 = vmatpush.bf16.msrb.mxu2 %v3032_v42  ;;  %2181 = vmatpush.bf16.msrb.mxu0 %v2488_v56  ;;  %v3451_v42 = vmul.f32 -1.442695, %v4074_v39 }
 0x146   : > { %v3460_v61 = vld [vmem:[#allocation5 + $0x1c] sm:$0xf]  ;;  %v3256_v1 = vor.u32 %v3660_v53, %v3253_v55 }
 0x147   : > { %v2453_v62 = vld [vmem:[#allocation5 + $0x38] sm:$0xf0]  ;;  %2219 = vmatpush.bf16.msrb.mxu3 %v3288_v47  ;;  %2194 = vmatpush.bf16.msrb.mxu1 %v2744_v59  ;;  %v1976_v12 = vpop.f32.mrf.mxu0  ;;  %3768 = vpow2.f32 %v3451_v42  ;;  %v2233_v47 = vadd.f32 1.0, %v3767_v44 }
 0x148   : > { %v3524_v63 = vld [vmem:[#allocation5 + $0x21c] sm:$0xf]  ;;  %v2456_v7 = vor.u32 %v3460_v61, %v2453_v62  ;;  %v1977_v13 = vadd.f32 %v1976_v12, %v1798_v11 }
 0x149   : > { %v2709_v2 = vld [vmem:[#allocation5 + $0x238] sm:$0xf0]  ;;  %2207 = vmatpush.bf16.msrb.mxu2 %v3000_v60  ;;  %v1989_v15 = vpop.f32.mrf.mxu1  ;;  %3770 = vrcp.f32 %v2233_v47  ;;  %v3450_v60 = vmul.f32 -1.442695, %v4067_v38  ;;  %vm2240_vm1 = vweird.f32 %v2233_v47 }
 0x14a   : > { %v3588_v3 = vld [vmem:[#allocation5 + $0x41c] sm:$0xf]  ;;  %v2712_v8 = vor.u32 %v3524_v63, %v2709_v2  ;;  %2182 = vmatpush.bf16.msrb.mxu0 %v2456_v7  ;;  %v1990_v16 = vadd.f32 %v1989_v15, %v1977_v13  ;;  %v1801_v63 = vperm.slane %v4053_v14, 6  ;;  %v2244_v7 = vand.u32 2147483647, %v2233_v47 }
 0x14b   : > { %v2965_v4 = vld [vmem:[#allocation5 + $0x438] sm:$0xf0]  ;;  %2220 = vmatpush.bf16.msrb.mxu3 %v3256_v1 }
 0x14c   : > { %v3652_v5 = vld [vmem:[#allocation5 + $0x61c] sm:$0xf]  ;;  %v2968_v9 = vor.u32 %v3588_v3, %v2965_v4  ;;  %2195 = vmatpush.bf16.msrb.mxu1 %v2712_v8  ;;  %vm2245_vm4 = vcmp.eq.f32.partialorder %v2244_v7, 8.507059e+37 }
 0x14d   : > { %v3221_v34 = vld [vmem:[#allocation5 + $0x638] sm:$0xf0]  ;;  %2183 = vmatmul.bf16.vlgmr.msrb.gmra.mxu0 %v4059_v48  ;;  %v3769_v52 = vpop.eup %3768 }
 0x14e   : > { %v3224_v10 = vor.u32 %v3652_v5, %v3221_v34  ;;  %2208 = vmatpush.bf16.msrb.mxu2 %v2968_v9  ;;  %v2271_v6 = vadd.f32 1.0, %v3769_v52  ;;  %v2246_v5 = vand.u32 2147483648, %v2233_v47  ;;  %v1802_v52 = vperm.slane %v4053_v14, 7 }
 0x14f   : > { %2196 = vmatmul.bf16.vlgmr.msrb.gmra.mxu1 %v4063_v51  ;;  %v1978_v23 = vpop.f32.mrf.mxu0  ;;  %v1799_v51 = vperm.slane %v4053_v14, 4  ;;  %v3771_v56 = vpop.eup %3770 }
 0x150   : > { %2221 = vmatpush.bf16.msrb.mxu3 %v3224_v10  ;;  %3772 = vrcp.f32 %v2271_v6  ;;  %v2236_v59 = vmul.f32 %v3771_v56, %v2233_v47  ;;  %vm2241_vm2 = vweird.f32 %v3771_v56  ;;  %v2247_v12 = vor.u32 1.1754944e-38, %v2246_v5 }
 0x151   : > { %2209 = vmatmul.bf16.vlgmr.msrb.gmra.mxu2 %v4022_v19  ;;  %v2002_v17 = vpop.f32.mrf.mxu2  ;;  %v1991_v24 = vpop.f32.mrf.mxu1  ;;  %3774 = vpow2.f32 %v3450_v60  ;;  %vm4096_vm3 = vmor %vm2240_vm1, %vm2241_vm2  ;;  %vm2278_vm5 = vweird.f32 %v2271_v6  ;;  %vm2320_vm1 = vcmask 1040384  }
 0x152   : > { %v2003_v18 = vadd.f32 %v2002_v17, %v1990_v16  ;;  %v2237_v61 = vsub.f32 1.0, %v2236_v59 }
 0x153   : > { %2222 = vmatmul.bf16.vlgmr.msrb.gmra.mxu3 %v4024_v22  ;;  %v2015_v20 = vpop.f32.mrf.mxu3 }
 0x154   : > { %v2016_v21 = vadd.f32 %v2015_v20, %v2003_v18  ;;  %v2238_v0 = vmul.f32 %v3771_v56, %v2237_v61  ;;  %v2284_v18 = vand.u32 2147483648, %v2271_v6 }
 0x156   : > { %v3773_v39 = vpop.eup %3772  ;;  %v3452_v3 = vmul.f32 -1.442695, %v2016_v21  ;;  %v2239_v34 = vadd.f32 %v3771_v56, %v2238_v0 }
 0x157   : > { %v2274_v62 = vmul.f32 %v3773_v39, %v2271_v6  ;;  %v3775_v38 = vpop.eup %3774  ;;  %vm2279_vm6 = vweird.f32 %v3773_v39 }
 0x158   : > { %3776 = vpow2.f32 %v3452_v3  ;;  %v2243_v16 = vsel %vm4096_vm3, %v3771_v56, %v2239_v34  ;;  %v2234_v17 = vadd.f32 1.0, %v3775_v38  ;;  %vm2280_vm7 = vmor %vm2278_vm5, %vm2279_vm6 }
 0x159   : > { %v2004_v25 = vpop.f32.mrf.mxu2  ;;  %v2275_v2 = vsub.f32 1.0, %v2274_v62  ;;  %v2248_v23 = vsel %vm2245_vm4, %v2247_v12, %v2243_v16 }
 0x15a   : > { %3778 = vrcp.f32 %v2234_v17  ;;  %vm2255_vm9 = vweird.f32 %v2234_v17  ;;  %v2261_v61 = vand.u32 2147483648, %v2234_v17  ;;  %v2259_v0 = vand.u32 2147483647, %v2234_v17 }
 0x15b   : > { %v2017_v48 = vpop.f32.mrf.mxu3  ;;  %v2276_v10 = vmul.f32 %v3773_v39, %v2275_v2 }
 0x15c   : > { %v2282_v48 = vand.u32 2147483647, %v2271_v6  ;;  %vm2260_vm12 = vcmp.eq.f32.partialorder %v2259_v0, 8.507059e+37 }
 0x15d   : > { %v2277_v25 = vadd.f32 %v3773_v39, %v2276_v10 }
 0x15e   : > { %vm2283_vm8 = vcmp.eq.f32.partialorder %v2282_v48, 8.507059e+37 }
 0x167   : > { %v2028_v26 = vpop.f32.mrf.mxu0 }
 0x168   : > { %v2029_v19 = vadd.f32 %v2028_v26, %v1799_v51  ;;  %v3777_v26 = vpop.eup %3776 }
 0x169   : > { %v2041_v27 = vpop.f32.mrf.mxu1 }
 0x16a   : > { %v2042_v22 = vadd.f32 %v2041_v27, %v2029_v19  ;;  %v2285_v19 = vor.u32 1.1754944e-38, %v2284_v18 }
 0x16f   : > { %v2030_v32 = vpop.f32.mrf.mxu0 }
 0x171   : > { %v2054_v28 = vpop.f32.mrf.mxu2  ;;  %v2043_v35 = vpop.f32.mrf.mxu1 }
 0x172   : > { %v2055_v29 = vadd.f32 %v2054_v28, %v2042_v22  ;;  %v2281_v28 = vsel %vm2280_vm7, %v3773_v39, %v2277_v25  ;;  %v3779_v35 = vpop.eup %3778 }
 0x173   : > { %v2067_v30 = vpop.f32.mrf.mxu3  ;;  %v2286_v32 = vsel %vm2283_vm8, %v2285_v19, %v2281_v28  ;;  %v2251_v40 = vmul.f32 %v3779_v35, %v2234_v17  ;;  %vm2256_vm10 = vweird.f32 %v3779_v35 }
 0x174   : > { %v4082_v31 = vadd.f32 %v2067_v30, %v2055_v29  ;;  %v2272_v29 = vadd.f32 1.0, %v3777_v26  ;;  %v2313_v44 = vmul.f32 %v2286_v32, %v239_v57  ;;  %vm4109_vm11 = vmor %vm2255_vm9, %vm2256_vm10 }
 0x176   : > { %vm2293_vm13 = vweird.f32 %v2272_v29  ;;  %v2299_v7 = vand.u32 2147483648, %v2272_v29  ;;  %v2297_v10 = vand.u32 2147483647, %v2272_v29 }
 0x178   : > { %v2300_v12 = vor.u32 1.1754944e-38, %v2299_v7  ;;  %vm2298_vm0 = vcmp.eq.f32.partialorder %v2297_v10, 8.507059e+37 }
 0x179   : > { %v2056_v36 = vpop.f32.mrf.mxu2 }
 0x17a   : > { %v2309_v36 = vsub.f32 1.0, %v2286_v32 }
 0x17b   : > { %v2069_v37 = vpop.f32.mrf.mxu3 }
 0x187   : > { %v4085_v41 = vpop.f32.mrf.mxu0 }
 0x189   : > { %v4088_v43 = vpop.f32.mrf.mxu1 }
 0x18f   : > { %v2082_v49 = vpop.f32.mrf.mxu0 }
 0x191   : > { %v4090_v45 = vpop.f32.mrf.mxu2  ;;  %v2095_v50 = vpop.f32.mrf.mxu1 }
 0x192   : > { %v2252_v50 = vsub.f32 1.0, %v2251_v40 }
 0x193   : > { %v4092_v46 = vpop.f32.mrf.mxu3 }
 0x194   : > { %v2253_v56 = vmul.f32 %v3779_v35, %v2252_v50 }
 0x199   : > { %v2108_v53 = vpop.f32.mrf.mxu2 }
 0x19b   : > { %v2121_v55 = vpop.f32.mrf.mxu3 }
 0x1a9   : > { %v2132_v1 = vpop.f32.mrf.mxu0 }
 0x1aa   : > { %v2133_v4 = vadd.f32 %v2132_v1, %v1801_v63  ;;  %v2254_v63 = vadd.f32 %v3779_v35, %v2253_v56 }
 0x1ab   : > { %v2145_v33 = vpop.f32.mrf.mxu1 }
 0x1ac   : > { %v2146_v8 = vadd.f32 %v2145_v33, %v2133_v4  ;;  %v2258_v5 = vsel %vm4109_vm11, %v3779_v35, %v2254_v63 }
 0x1b1   : > { %v2134_v21 = vpop.f32.mrf.mxu0 }
 0x1b3   : > { %v2158_v11 = vpop.f32.mrf.mxu2  ;;  %v2147_v24 = vpop.f32.mrf.mxu1 }
 0x1b4   : > { %v2159_v13 = vadd.f32 %v2158_v11, %v2146_v8 }
 0x1b5   : > { %v2171_v15 = vpop.f32.mrf.mxu3 }
 0x1b6   : > { %v2172_v20 = vadd.f32 %v2171_v15, %v2159_v13 }
 0x1b8   : > { %v2303_v51 = vmul.f32 %v2248_v23, %v2172_v20 }
 0x1ba   : > { %v2305_v27 = vadd.f32 %v2303_v51, %v4082_v31  ;;  %v1800_v31 = vperm.slane %v4053_v14, 5 }
 0x1bb   : > { %v2160_v22 = vpop.f32.mrf.mxu2 }
 0x1bc   : > { %3780 = vtanh.f32 %v2305_v27  ;;  %v2081_v6 = vadd.f32 %v4085_v41, %v1800_v31  ;;  %v2262_v41 = vor.u32 1.1754944e-38, %v2261_v61 }
 0x1bd   : > { %v2173_v30 = vpop.f32.mrf.mxu3  ;;  %3782 = vrcp.f32 %v2272_v29 }
 0x1be   : > { %v2094_v57 = vadd.f32 %v4088_v43, %v2081_v6  ;;  %v2263_v9 = vsel %vm2260_vm12, %v2262_v41, %v2258_v5 }
 0x1c0   : > { %v2107_v3 = vadd.f32 %v4090_v45, %v2094_v57 }
 0x1c2   : > { %v3781_v37 = vpop.eup %3780  ;;  %v2120_v11 = vadd.f32 %v4092_v46, %v2107_v3  ;;  %v2323_v46 = vlaneseq }
 0x1c3   : > { %v2311_v42 = vmul.f32 %v3781_v37, %v2309_v36  ;;  %v3783_v49 = vpop.eup %3782 }
 0x1c4   : > { %v2289_v53 = vmul.f32 %v3783_v49, %v2272_v29  ;;  %vm2294_vm14 = vweird.f32 %v3783_v49  ;;  %vm2325_vm2 = vcmp.lt.s32.totalorder %v2323_v46, 256 }
 0x1c5   : > { %v2315_v47 = vadd.f32 %v2313_v44, %v2311_v42  ;;  %vm2295_vm15 = vmor %vm2293_vm13, %vm2294_vm14 }
 0x1c6   : > { %v2290_v60 = vsub.f32 1.0, %v2289_v53 }
 0x1c8   : > { %v2291_v14 = vmul.f32 %v3783_v49, %v2290_v60 }
 0x1ca   : > { %v2184_v55 = vpop.f32.mrf.mxu0  ;;  %v2292_v38 = vadd.f32 %v3783_v49, %v2291_v14 }
 0x1cb   : > { %v2185_v59 = vadd.f32 %v2184_v55, %v1802_v52 }
 0x1cc   : > { %v2197_v39 = vpop.f32.mrf.mxu1  ;;  %v2296_v16 = vsel %vm2295_vm15, %v3783_v49, %v2292_v38 }
 0x1cd   : > { %v2198_v62 = vadd.f32 %v2197_v39, %v2185_v59  ;;  %v2301_v18 = vsel %vm2298_vm0, %v2300_v12, %v2296_v16 }
 0x1ce   : > { %v2310_v20 = vsub.f32 1.0, %v2301_v18  ;;  %v2314_v24 = vmul.f32 %v2301_v18, %v240_v58 }
 0x1d2   : > { %v2186_v34 = vpop.f32.mrf.mxu0 }
 0x1d4   : > { %v2210_v2 = vpop.f32.mrf.mxu2  ;;  %v2199_v43 = vpop.f32.mrf.mxu1 }
 0x1d5   : > { %v2211_v4 = vadd.f32 %v2210_v2, %v2198_v62 }
 0x1d6   : > { %v2223_v33 = vpop.f32.mrf.mxu3 }
 0x1d7   : > { %v2224_v8 = vadd.f32 %v2223_v33, %v2211_v4 }
 0x1d9   : > { %v2304_v45 = vmul.f32 %v2263_v9, %v2224_v8 }
 0x1db   : > { %v2306_v13 = vadd.f32 %v2304_v45, %v2120_v11 }
 0x1dc   : > { %v2212_v15 = vpop.f32.mrf.mxu2 }
 0x1dd   : > { %3784 = vtanh.f32 %v2306_v13 }
 0x1de   : > { %v2225_v17 = vpop.f32.mrf.mxu3 }
 0x1e3   : > { %v3785_v21 = vpop.eup %3784 }
 0x1e4   : > { %v2312_v23 = vmul.f32 %v3785_v21, %v2310_v20 }
 0x1e6   : > { %v2316_v25 = vadd.f32 %v2314_v24, %v2312_v23 }
 0x1e8   : > { %v2319_v48 = vrot.slane %v2316_v25, 7 }
 0x1ea   : > { %v2321_v51 = vsel %vm2320_vm1, %v2315_v47, %v2319_v48 }
 0x1eb   : > { %2327 = vst.msk [vmem:[#allocation2] sm:$0x3] %vm2325_vm2, %v2321_v51 }
 0x1ec   : > { %2328 = vst.msk [vmem:[%s219_s26] sm:$0x3] %vm2325_vm2, %v2321_v51 }
 0x1ed   : > { %3857 = shalt.err (!%p3854_p9)
}
 0x1ee   : > { %3717 = dma.vmem_to_hbm [thread:$0]  (%p3975_p5), %s2343_s14, 32, %s2345_s16, %s2330_s0  }
 0x1ef PF: > { %p3729_p10 = scmp.ge.s32.totalorder %s3898_s25, 2  ;;  %s2356_s15 = sand.u32 1, %s3886_s22  }
 0x1f0   : > { %s2357_s17 = scalar_lea.sflag [#allocation7], %s2356_s15 }
 0x1f1   : > { %p3724_p11 = pnand %p3729_p10, %p3979_p6 }
 0x1f3   : > { %p3725_p12 = pneg %p3724_p11 }
 0x1f5   : > { %3881 = dma.done.wait (%p3725_p12), %s2357_s17, 32  }
 0x1f6   : > { %3883 = vsyncadd (%p3725_p12), %s2357_s17, 4294967264  ;;  %p24_p13 = scmp.ge.s32.totalorder %s3962_s27, 10   ;;  %s4168_s22 = smov %s3890_s23 }
 0x1f7   : > { %s4169_s23 = smov %s3894_s24  ;;  %s4170_s24 = smov %s3973_s30 }
 0x1f8   : > { %s4171_s25 = smov %s3962_s27  ;;  %26 = sbr.rel (!%p24_p13) target bundleno = 10 (0xa), region = 80 }
 0x1fd   :  { %2363 = vsyncpa [#allocation6], 1 }
 0x1fe   :  { %2365 = vsyncpa [#allocation6 + $0x1], 1 }
 0x1ff   :  { %2366 = vsyncpa [#allocation7], 1 }
 0x200   :  { %2368 = vsyncpa [#allocation7 + $0x1], 1 }

</bundles_post_ra>
